<compile_context>
chip_gen: v5e
topology: v5e:2x2
jax: 0.10.0
libtpu: 0.0.40
codegen_flags: <defaults>
</compile_context>

<pallas_src>
import functools

import jax
import jax.numpy as jnp
from jax import lax
from jax.experimental import pallas as pl
from jax.experimental.pallas import tpu as pltpu  # noqa: F401  (TPU backend import)


CFG = dict(
    vocab_size=32,
    type_vocab_size=2,
    max_position=16,
    hidden=32,
    num_heads=2,
    num_layers=2,
    intermediate=64,
    num_classes=3,
)


# ----------------------------- in-kernel helpers -----------------------------

def _layernorm(x, g, b, eps=1e-12):
    mean = jnp.mean(x, axis=-1, keepdims=True)
    var = jnp.mean((x - mean) ** 2, axis=-1, keepdims=True)
    return (x - mean) * lax.rsqrt(var + eps) * g + b


def _gelu(x):
    # tanh-approximation of GELU (HF BERT default is erf-GELU; tanh form stays on the EUP).
    c = 0.7978845608028654  # sqrt(2/pi)
    return 0.5 * x * (1.0 + jnp.tanh(c * (x + 0.044715 * x * x * x)))


# ----------------------------- fused forward kernel -----------------------------

def fused_bert_kernel(
        x_ref, mask_ref,
        emb_g_ref, emb_b_ref,
        wqkv_ref, bqkv_ref, wo_ref, bo_ref, ln1_g_ref, ln1_b_ref,
        w1_ref, b1_ref, w2_ref, b2_ref, ln2_g_ref, ln2_b_ref,
        pool_w_ref, pool_b_ref, cls_w_ref, cls_b_ref,
        logits_ref,
        *, B, S, H, NH, L):
    D = H // NH
    scale = 1.0 / float(D) ** 0.5
    # contract the LAST dim of both operands: q @ k^T without an explicit transpose.
    qk_dims = (((1,), (1,)), ((), ()))

    x = x_ref[...]                                                    # (B*S, H)
    x = _layernorm(x, emb_g_ref[...], emb_b_ref[...])                 # embedding LayerNorm
    mask = mask_ref[...]                                              # (B, S) additive mask

    for li in range(L):                                               # static unroll (L=2)
        # ---- fused Q|K|V projection: single (B*S, H) x (H, 3H) matmul ----
        qkv = (jnp.dot(x, wqkv_ref[li], preferred_element_type=jnp.float32)
               + bqkv_ref[li])                                        # (B*S, 3H)

        # ---- multi-head scaled-dot-product attention, fully VMEM/vreg resident ----
        batch_rows = []
        for b in range(B):                                            # static unroll (B=2)
            row = qkv[b * S:(b + 1) * S, :]                           # (S, 3H)
            m_b = mask[b:b + 1, :]                                    # (1, S) key mask
            heads = []
            for h in range(NH):                                       # static unroll (NH=2)
                qh = row[:, h * D:(h + 1) * D]                        # (S, D)
                kh = row[:, H + h * D:H + (h + 1) * D]                # (S, D)
                vh = row[:, 2 * H + h * D:2 * H + (h + 1) * D]        # (S, D)
                s = lax.dot_general(qh, kh, qk_dims,
                                    preferred_element_type=jnp.float32)
                s = s * scale + m_b                                   # (S, S)
                s = s - jnp.max(s, axis=-1, keepdims=True)
                p = jnp.exp(s)
                p = p * pl.reciprocal(jnp.sum(p, axis=-1, keepdims=True), approx=True)
                heads.append(jnp.dot(p, vh, preferred_element_type=jnp.float32))
            batch_rows.append(jnp.concatenate(heads, axis=-1))        # (S, H)
        ctx = jnp.concatenate(batch_rows, axis=0)                     # (B*S, H)

        # ---- attention output projection + residual LayerNorm ----
        attn_out = (jnp.dot(ctx, wo_ref[li], preferred_element_type=jnp.float32)
                    + bo_ref[li])
        x = _layernorm(attn_out + x, ln1_g_ref[li], ln1_b_ref[li])

        # ---- feed-forward + residual LayerNorm ----
        ff = _gelu(jnp.dot(x, w1_ref[li], preferred_element_type=jnp.float32) + b1_ref[li])
        ff = jnp.dot(ff, w2_ref[li], preferred_element_type=jnp.float32) + b2_ref[li]
        x = _layernorm(ff + x, ln2_g_ref[li], ln2_b_ref[li])

    # ---- BERT pooler over the [CLS] token of each sequence ----
    cls = jnp.concatenate([x[b * S:b * S + 1, :] for b in range(B)], axis=0)   # (B, H)
    pooled = jnp.tanh(jnp.dot(cls, pool_w_ref[...], preferred_element_type=jnp.float32)
                      + pool_b_ref[...])

    # Dropout(0.1) is identity in eval/inference mode (forward-pass semantics).
    logits = (jnp.dot(pooled, cls_w_ref[...], preferred_element_type=jnp.float32)
              + cls_b_ref[...])                                       # (B, num_classes)
    logits_ref[...] = logits.astype(logits_ref.dtype)


# ----------------------------- parameters -----------------------------

def init_params(key):
    H, I, L = CFG["hidden"], CFG["intermediate"], CFG["num_layers"]
    C, V = CFG["num_classes"], CFG["vocab_size"]
    T, P = CFG["type_vocab_size"], CFG["max_position"]
    s = 0.02

    def nrm(k, shape):
        return s * jax.random.normal(k, shape, dtype=jnp.float32)

    k = jax.random.split(key, 10)
    return {
        "word_emb": nrm(k[0], (V, H)),
        "pos_emb": nrm(k[1], (P, H)),
        "type_emb": nrm(k[2], (T, H)),
        "emb_ln_g": jnp.ones((1, H), jnp.float32),
        "emb_ln_b": jnp.zeros((1, H), jnp.float32),
        # Per-layer params stacked along a leading L axis; Q|K|V fused along output dim.
        "wqkv": nrm(k[3], (L, H, 3 * H)),
        "bqkv": jnp.zeros((L, 1, 3 * H), jnp.float32),
        "wo": nrm(k[4], (L, H, H)),
        "bo": jnp.zeros((L, 1, H), jnp.float32),
        "ln1_g": jnp.ones((L, 1, H), jnp.float32),
        "ln1_b": jnp.zeros((L, 1, H), jnp.float32),
        "w1": nrm(k[5], (L, H, I)),
        "b1": jnp.zeros((L, 1, I), jnp.float32),
        "w2": nrm(k[6], (L, I, H)),
        "b2": jnp.zeros((L, 1, H), jnp.float32),
        "ln2_g": jnp.ones((L, 1, H), jnp.float32),
        "ln2_b": jnp.zeros((L, 1, H), jnp.float32),
        "pool_w": nrm(k[7], (H, H)),
        "pool_b": jnp.zeros((1, H), jnp.float32),
        "cls_w": nrm(k[8], (H, C)),
        "cls_b": jnp.zeros((1, C), jnp.float32),
    }


# ----------------------------- forward wrapper -----------------------------

def custom_model_forward(params, input_ids, attention_mask, token_type_ids):
    """Equivalent of CustomModel.forward(input_ids, attention_mask, token_type_ids)."""
    B, S = input_ids.shape
    H, NH, L = CFG["hidden"], CFG["num_heads"], CFG["num_layers"]
    C = CFG["num_classes"]

    # Embedding gathers are data-dependent lookups; done as plain-JAX glue (tiny).
    x = (params["word_emb"][input_ids]
         + params["pos_emb"][jnp.arange(S)][None, :, :]
         + params["type_emb"][token_type_ids]).reshape(B * S, H).astype(jnp.float32)

    # Extended additive attention mask: 0 for keep, -10000 for masked.  (B, S)
    add_mask = (1.0 - attention_mask.astype(jnp.float32)) * -10000.0

    kernel = functools.partial(fused_bert_kernel, B=B, S=S, H=H, NH=NH, L=L)
    # Single pallas_call, no grid: every operand is a whole-array VMEM block.
    return pl.pallas_call(
        kernel,
        out_shape=jax.ShapeDtypeStruct((B, C), jnp.float32),
    )(x, add_mask,
      params["emb_ln_g"], params["emb_ln_b"],
      params["wqkv"], params["bqkv"], params["wo"], params["bo"],
      params["ln1_g"], params["ln1_b"],
      params["w1"], params["b1"], params["w2"], params["b2"],
      params["ln2_g"], params["ln2_b"],
      params["pool_w"], params["pool_b"], params["cls_w"], params["cls_b"])

# TODO(synk): the loss_fn / labels branch of forward() is training-only and not implemented.


# ----------------------------- driver -----------------------------

if __name__ == "__main__":
    B, S = 2, 8
    key = jax.random.PRNGKey(0)
    k_ids, k_params = jax.random.split(key)

    input_ids = jax.random.randint(k_ids, (B, S), 0, CFG["vocab_size"], dtype=jnp.int32)
    token_type_ids = jnp.zeros((B, S), dtype=jnp.int32)
    attention_mask = jnp.ones((B, S), dtype=jnp.int32)

    params = init_params(k_params)

    fwd = jax.jit(lambda i, a, t: custom_model_forward(params, i, a, t))
    logits = fwd(input_ids, attention_mask, token_type_ids)
    jax.block_until_ready(logits)

    assert logits.shape == (B, CFG["num_classes"]), logits.shape
    assert logits.dtype == jnp.float32
    print("KERNEL_OK")
</pallas_src>

<mosaic_0001>
module attributes {stable_mosaic.version = 11 : i64} {
  func.func @fused_bert_kernel(%arg0: memref<16x32xf32, #tpu.memory_space<vmem>>, %arg1: memref<2x8xf32, #tpu.memory_space<vmem>>, %arg2: memref<1x32xf32, #tpu.memory_space<vmem>>, %arg3: memref<1x32xf32, #tpu.memory_space<vmem>>, %arg4: memref<2x32x96xf32, #tpu.memory_space<vmem>>, %arg5: memref<2x1x96xf32, #tpu.memory_space<vmem>>, %arg6: memref<2x32x32xf32, #tpu.memory_space<vmem>>, %arg7: memref<2x1x32xf32, #tpu.memory_space<vmem>>, %arg8: memref<2x1x32xf32, #tpu.memory_space<vmem>>, %arg9: memref<2x1x32xf32, #tpu.memory_space<vmem>>, %arg10: memref<2x32x64xf32, #tpu.memory_space<vmem>>, %arg11: memref<2x1x64xf32, #tpu.memory_space<vmem>>, %arg12: memref<2x64x32xf32, #tpu.memory_space<vmem>>, %arg13: memref<2x1x32xf32, #tpu.memory_space<vmem>>, %arg14: memref<2x1x32xf32, #tpu.memory_space<vmem>>, %arg15: memref<2x1x32xf32, #tpu.memory_space<vmem>>, %arg16: memref<32x32xf32, #tpu.memory_space<vmem>>, %arg17: memref<1x32xf32, #tpu.memory_space<vmem>>, %arg18: memref<32x3xf32, #tpu.memory_space<vmem>>, %arg19: memref<1x3xf32, #tpu.memory_space<vmem>>, %arg20: memref<2x3xf32, #tpu.memory_space<vmem>>) attributes {dimension_semantics = [], scalar_prefetch = 0 : i64, scratch_operands = 0 : i64, tpu.core_type = #tpu.core_type<tc>} {
    %c0 = arith.constant 0 : index
    %c0_0 = arith.constant 0 : index
    %0 = vector.load %arg0[%c0, %c0_0] : memref<16x32xf32, #tpu.memory_space<vmem>>, vector<16x32xf32>
    %c0_1 = arith.constant 0 : index
    %c0_2 = arith.constant 0 : index
    %1 = vector.load %arg2[%c0_1, %c0_2] : memref<1x32xf32, #tpu.memory_space<vmem>>, vector<1x32xf32>
    %c0_3 = arith.constant 0 : index
    %c0_4 = arith.constant 0 : index
    %2 = vector.load %arg3[%c0_3, %c0_4] : memref<1x32xf32, #tpu.memory_space<vmem>>, vector<1x32xf32>
    %cst = arith.constant dense<0.000000e+00> : vector<16xf32>
    %3 = vector.multi_reduction <add>, %0, %cst [1] : vector<16x32xf32> to vector<16xf32>
    %4 = vector.shape_cast %3 : vector<16xf32> to vector<16x1xf32>
    %cst_5 = arith.constant 3.200000e+01 : f32
    %5 = vector.broadcast %cst_5 : f32 to vector<16x1xf32>
    %6 = arith.divf %4, %5 : vector<16x1xf32>
    %7 = vector.broadcast %6 : vector<16x1xf32> to vector<16x32xf32>
    %8 = arith.subf %0, %7 : vector<16x32xf32>
    %9 = arith.mulf %8, %8 : vector<16x32xf32>
    %cst_6 = arith.constant dense<0.000000e+00> : vector<16xf32>
    %10 = vector.multi_reduction <add>, %9, %cst_6 [1] : vector<16x32xf32> to vector<16xf32>
    %11 = vector.shape_cast %10 : vector<16xf32> to vector<16x1xf32>
    %cst_7 = arith.constant 3.200000e+01 : f32
    %12 = vector.broadcast %cst_7 : f32 to vector<16x1xf32>
    %13 = arith.divf %11, %12 : vector<16x1xf32>
    %14 = vector.broadcast %6 : vector<16x1xf32> to vector<16x32xf32>
    %15 = arith.subf %0, %14 : vector<16x32xf32>
    %cst_8 = arith.constant 9.99999996E-13 : f32
    %16 = vector.broadcast %cst_8 : f32 to vector<16x1xf32>
    %17 = arith.addf %13, %16 : vector<16x1xf32>
    %18 = math.rsqrt %17 : vector<16x1xf32>
    %19 = vector.broadcast %18 : vector<16x1xf32> to vector<16x32xf32>
    %20 = arith.mulf %15, %19 : vector<16x32xf32>
    %21 = vector.broadcast %1 : vector<1x32xf32> to vector<16x32xf32>
    %22 = arith.mulf %20, %21 : vector<16x32xf32>
    %23 = vector.broadcast %2 : vector<1x32xf32> to vector<16x32xf32>
    %24 = arith.addf %22, %23 : vector<16x32xf32>
    %c0_9 = arith.constant 0 : index
    %c0_10 = arith.constant 0 : index
    %25 = vector.load %arg1[%c0_9, %c0_10] : memref<2x8xf32, #tpu.memory_space<vmem>>, vector<2x8xf32>
    %c0_11 = arith.constant 0 : index
    %c0_12 = arith.constant 0 : index
    %c0_13 = arith.constant 0 : index
    %26 = vector.load %arg4[%c0_11, %c0_12, %c0_13] : memref<2x32x96xf32, #tpu.memory_space<vmem>>, vector<1x32x96xf32>
    %27 = vector.shape_cast %26 : vector<1x32x96xf32> to vector<32x96xf32>
    %cst_14 = arith.constant dense<0.000000e+00> : vector<16x96xf32>
    %28 = tpu.matmul %24, %27, %cst_14 {dimension_numbers = #tpu.dot_dimension_numbers<[1], [0], [0], [1], [0, 0, 1, 1], [], []>} : vector<16x32xf32>, vector<32x96xf32>, vector<16x96xf32> -> vector<16x96xf32>
    %c0_15 = arith.constant 0 : index
    %c0_16 = arith.constant 0 : index
    %c0_17 = arith.constant 0 : index
    %29 = vector.load %arg5[%c0_15, %c0_16, %c0_17] : memref<2x1x96xf32, #tpu.memory_space<vmem>>, vector<1x1x96xf32>
    %30 = vector.shape_cast %29 : vector<1x1x96xf32> to vector<1x96xf32>
    %31 = vector.broadcast %30 : vector<1x96xf32> to vector<16x96xf32>
    %32 = arith.addf %28, %31 : vector<16x96xf32>
    %33 = vector.extract_strided_slice %32 {offsets = [0, 0], sizes = [8, 96], strides = [1, 1]} : vector<16x96xf32> to vector<8x96xf32>
    %34 = vector.extract_strided_slice %25 {offsets = [0, 0], sizes = [1, 8], strides = [1, 1]} : vector<2x8xf32> to vector<1x8xf32>
    %35 = vector.extract_strided_slice %33 {offsets = [0, 0], sizes = [8, 16], strides = [1, 1]} : vector<8x96xf32> to vector<8x16xf32>
    %36 = vector.extract_strided_slice %33 {offsets = [0, 32], sizes = [8, 16], strides = [1, 1]} : vector<8x96xf32> to vector<8x16xf32>
    %37 = vector.extract_strided_slice %33 {offsets = [0, 64], sizes = [8, 16], strides = [1, 1]} : vector<8x96xf32> to vector<8x16xf32>
    %cst_18 = arith.constant dense<0.000000e+00> : vector<8x8xf32>
    %38 = tpu.matmul %35, %36, %cst_18 {dimension_numbers = #tpu.dot_dimension_numbers<[1], [1], [0], [0], [0, 0, 1, 0], [], []>} : vector<8x16xf32>, vector<8x16xf32>, vector<8x8xf32> -> vector<8x8xf32>
    %cst_19 = arith.constant 2.500000e-01 : f32
    %39 = vector.broadcast %cst_19 : f32 to vector<8x8xf32>
    %40 = arith.mulf %38, %39 : vector<8x8xf32>
    %41 = vector.broadcast %34 : vector<1x8xf32> to vector<8x8xf32>
    %42 = arith.addf %40, %41 : vector<8x8xf32>
    %cst_20 = arith.constant dense<0xFF800000> : vector<8xf32>
    %43 = vector.multi_reduction <maximumf>, %42, %cst_20 [1] : vector<8x8xf32> to vector<8xf32>
    %44 = vector.shape_cast %43 : vector<8xf32> to vector<8x1xf32>
    %45 = vector.broadcast %44 : vector<8x1xf32> to vector<8x8xf32>
    %46 = arith.subf %42, %45 : vector<8x8xf32>
    %47 = math.exp %46 : vector<8x8xf32>
    %cst_21 = arith.constant dense<0.000000e+00> : vector<8xf32>
    %48 = vector.multi_reduction <add>, %47, %cst_21 [1] : vector<8x8xf32> to vector<8xf32>
    %49 = vector.shape_cast %48 : vector<8xf32> to vector<8x1xf32>
    %50 = tpu.reciprocal %49 {approx = true} : vector<8x1xf32> -> vector<8x1xf32>
    %51 = vector.broadcast %50 : vector<8x1xf32> to vector<8x8xf32>
    %52 = arith.mulf %47, %51 : vector<8x8xf32>
    %cst_22 = arith.constant dense<0.000000e+00> : vector<8x16xf32>
    %53 = tpu.matmul %52, %37, %cst_22 {dimension_numbers = #tpu.dot_dimension_numbers<[1], [0], [0], [1], [0, 0, 1, 1], [], []>} : vector<8x8xf32>, vector<8x16xf32>, vector<8x16xf32> -> vector<8x16xf32>
    %54 = vector.extract_strided_slice %33 {offsets = [0, 16], sizes = [8, 16], strides = [1, 1]} : vector<8x96xf32> to vector<8x16xf32>
    %55 = vector.extract_strided_slice %33 {offsets = [0, 48], sizes = [8, 16], strides = [1, 1]} : vector<8x96xf32> to vector<8x16xf32>
    %56 = vector.extract_strided_slice %33 {offsets = [0, 80], sizes = [8, 16], strides = [1, 1]} : vector<8x96xf32> to vector<8x16xf32>
    %cst_23 = arith.constant dense<0.000000e+00> : vector<8x8xf32>
    %57 = tpu.matmul %54, %55, %cst_23 {dimension_numbers = #tpu.dot_dimension_numbers<[1], [1], [0], [0], [0, 0, 1, 0], [], []>} : vector<8x16xf32>, vector<8x16xf32>, vector<8x8xf32> -> vector<8x8xf32>
    %cst_24 = arith.constant 2.500000e-01 : f32
    %58 = vector.broadcast %cst_24 : f32 to vector<8x8xf32>
    %59 = arith.mulf %57, %58 : vector<8x8xf32>
    %60 = vector.broadcast %34 : vector<1x8xf32> to vector<8x8xf32>
    %61 = arith.addf %59, %60 : vector<8x8xf32>
    %cst_25 = arith.constant dense<0xFF800000> : vector<8xf32>
    %62 = vector.multi_reduction <maximumf>, %61, %cst_25 [1] : vector<8x8xf32> to vector<8xf32>
    %63 = vector.shape_cast %62 : vector<8xf32> to vector<8x1xf32>
    %64 = vector.broadcast %63 : vector<8x1xf32> to vector<8x8xf32>
    %65 = arith.subf %61, %64 : vector<8x8xf32>
    %66 = math.exp %65 : vector<8x8xf32>
    %cst_26 = arith.constant dense<0.000000e+00> : vector<8xf32>
    %67 = vector.multi_reduction <add>, %66, %cst_26 [1] : vector<8x8xf32> to vector<8xf32>
    %68 = vector.shape_cast %67 : vector<8xf32> to vector<8x1xf32>
    %69 = tpu.reciprocal %68 {approx = true} : vector<8x1xf32> -> vector<8x1xf32>
    %70 = vector.broadcast %69 : vector<8x1xf32> to vector<8x8xf32>
    %71 = arith.mulf %66, %70 : vector<8x8xf32>
    %cst_27 = arith.constant dense<0.000000e+00> : vector<8x16xf32>
    %72 = tpu.matmul %71, %56, %cst_27 {dimension_numbers = #tpu.dot_dimension_numbers<[1], [0], [0], [1], [0, 0, 1, 1], [], []>} : vector<8x8xf32>, vector<8x16xf32>, vector<8x16xf32> -> vector<8x16xf32>
    %73 = tpu.concatenate %53, %72 in 1 : vector<8x16xf32>, vector<8x16xf32> -> vector<8x32xf32>
    %74 = vector.extract_strided_slice %32 {offsets = [8, 0], sizes = [8, 96], strides = [1, 1]} : vector<16x96xf32> to vector<8x96xf32>
    %75 = vector.extract_strided_slice %25 {offsets = [1, 0], sizes = [1, 8], strides = [1, 1]} : vector<2x8xf32> to vector<1x8xf32>
    %76 = vector.extract_strided_slice %74 {offsets = [0, 0], sizes = [8, 16], strides = [1, 1]} : vector<8x96xf32> to vector<8x16xf32>
    %77 = vector.extract_strided_slice %74 {offsets = [0, 32], sizes = [8, 16], strides = [1, 1]} : vector<8x96xf32> to vector<8x16xf32>
    %78 = vector.extract_strided_slice %74 {offsets = [0, 64], sizes = [8, 16], strides = [1, 1]} : vector<8x96xf32> to vector<8x16xf32>
    %cst_28 = arith.constant dense<0.000000e+00> : vector<8x8xf32>
    %79 = tpu.matmul %76, %77, %cst_28 {dimension_numbers = #tpu.dot_dimension_numbers<[1], [1], [0], [0], [0, 0, 1, 0], [], []>} : vector<8x16xf32>, vector<8x16xf32>, vector<8x8xf32> -> vector<8x8xf32>
    %cst_29 = arith.constant 2.500000e-01 : f32
    %80 = vector.broadcast %cst_29 : f32 to vector<8x8xf32>
    %81 = arith.mulf %79, %80 : vector<8x8xf32>
    %82 = vector.broadcast %75 : vector<1x8xf32> to vector<8x8xf32>
    %83 = arith.addf %81, %82 : vector<8x8xf32>
    %cst_30 = arith.constant dense<0xFF800000> : vector<8xf32>
    %84 = vector.multi_reduction <maximumf>, %83, %cst_30 [1] : vector<8x8xf32> to vector<8xf32>
    %85 = vector.shape_cast %84 : vector<8xf32> to vector<8x1xf32>
    %86 = vector.broadcast %85 : vector<8x1xf32> to vector<8x8xf32>
    %87 = arith.subf %83, %86 : vector<8x8xf32>
    %88 = math.exp %87 : vector<8x8xf32>
    %cst_31 = arith.constant dense<0.000000e+00> : vector<8xf32>
    %89 = vector.multi_reduction <add>, %88, %cst_31 [1] : vector<8x8xf32> to vector<8xf32>
    %90 = vector.shape_cast %89 : vector<8xf32> to vector<8x1xf32>
    %91 = tpu.reciprocal %90 {approx = true} : vector<8x1xf32> -> vector<8x1xf32>
    %92 = vector.broadcast %91 : vector<8x1xf32> to vector<8x8xf32>
    %93 = arith.mulf %88, %92 : vector<8x8xf32>
    %cst_32 = arith.constant dense<0.000000e+00> : vector<8x16xf32>
    %94 = tpu.matmul %93, %78, %cst_32 {dimension_numbers = #tpu.dot_dimension_numbers<[1], [0], [0], [1], [0, 0, 1, 1], [], []>} : vector<8x8xf32>, vector<8x16xf32>, vector<8x16xf32> -> vector<8x16xf32>
    %95 = vector.extract_strided_slice %74 {offsets = [0, 16], sizes = [8, 16], strides = [1, 1]} : vector<8x96xf32> to vector<8x16xf32>
    %96 = vector.extract_strided_slice %74 {offsets = [0, 48], sizes = [8, 16], strides = [1, 1]} : vector<8x96xf32> to vector<8x16xf32>
    %97 = vector.extract_strided_slice %74 {offsets = [0, 80], sizes = [8, 16], strides = [1, 1]} : vector<8x96xf32> to vector<8x16xf32>
    %cst_33 = arith.constant dense<0.000000e+00> : vector<8x8xf32>
    %98 = tpu.matmul %95, %96, %cst_33 {dimension_numbers = #tpu.dot_dimension_numbers<[1], [1], [0], [0], [0, 0, 1, 0], [], []>} : vector<8x16xf32>, vector<8x16xf32>, vector<8x8xf32> -> vector<8x8xf32>
    %cst_34 = arith.constant 2.500000e-01 : f32
    %99 = vector.broadcast %cst_34 : f32 to vector<8x8xf32>
    %100 = arith.mulf %98, %99 : vector<8x8xf32>
    %101 = vector.broadcast %75 : vector<1x8xf32> to vector<8x8xf32>
    %102 = arith.addf %100, %101 : vector<8x8xf32>
    %cst_35 = arith.constant dense<0xFF800000> : vector<8xf32>
    %103 = vector.multi_reduction <maximumf>, %102, %cst_35 [1] : vector<8x8xf32> to vector<8xf32>
    %104 = vector.shape_cast %103 : vector<8xf32> to vector<8x1xf32>
    %105 = vector.broadcast %104 : vector<8x1xf32> to vector<8x8xf32>
    %106 = arith.subf %102, %105 : vector<8x8xf32>
    %107 = math.exp %106 : vector<8x8xf32>
    %cst_36 = arith.constant dense<0.000000e+00> : vector<8xf32>
    %108 = vector.multi_reduction <add>, %107, %cst_36 [1] : vector<8x8xf32> to vector<8xf32>
    %109 = vector.shape_cast %108 : vector<8xf32> to vector<8x1xf32>
    %110 = tpu.reciprocal %109 {approx = true} : vector<8x1xf32> -> vector<8x1xf32>
    %111 = vector.broadcast %110 : vector<8x1xf32> to vector<8x8xf32>
    %112 = arith.mulf %107, %111 : vector<8x8xf32>
    %cst_37 = arith.constant dense<0.000000e+00> : vector<8x16xf32>
    %113 = tpu.matmul %112, %97, %cst_37 {dimension_numbers = #tpu.dot_dimension_numbers<[1], [0], [0], [1], [0, 0, 1, 1], [], []>} : vector<8x8xf32>, vector<8x16xf32>, vector<8x16xf32> -> vector<8x16xf32>
    %114 = tpu.concatenate %94, %113 in 1 : vector<8x16xf32>, vector<8x16xf32> -> vector<8x32xf32>
    %115 = tpu.concatenate %73, %114 in 0 : vector<8x32xf32>, vector<8x32xf32> -> vector<16x32xf32>
    %c0_38 = arith.constant 0 : index
    %c0_39 = arith.constant 0 : index
    %c0_40 = arith.constant 0 : index
    %116 = vector.load %arg6[%c0_38, %c0_39, %c0_40] : memref<2x32x32xf32, #tpu.memory_space<vmem>>, vector<1x32x32xf32>
    %117 = vector.shape_cast %116 : vector<1x32x32xf32> to vector<32x32xf32>
    %cst_41 = arith.constant dense<0.000000e+00> : vector<16x32xf32>
    %118 = tpu.matmul %115, %117, %cst_41 {dimension_numbers = #tpu.dot_dimension_numbers<[1], [0], [0], [1], [0, 0, 1, 1], [], []>} : vector<16x32xf32>, vector<32x32xf32>, vector<16x32xf32> -> vector<16x32xf32>
    %c0_42 = arith.constant 0 : index
    %c0_43 = arith.constant 0 : index
    %c0_44 = arith.constant 0 : index
    %119 = vector.load %arg7[%c0_42, %c0_43, %c0_44] : memref<2x1x32xf32, #tpu.memory_space<vmem>>, vector<1x1x32xf32>
    %120 = vector.shape_cast %119 : vector<1x1x32xf32> to vector<1x32xf32>
    %121 = vector.broadcast %120 : vector<1x32xf32> to vector<16x32xf32>
    %122 = arith.addf %118, %121 : vector<16x32xf32>
    %123 = arith.addf %122, %24 : vector<16x32xf32>
    %c0_45 = arith.constant 0 : index
    %c0_46 = arith.constant 0 : index
    %c0_47 = arith.constant 0 : index
    %124 = vector.load %arg8[%c0_45, %c0_46, %c0_47] : memref<2x1x32xf32, #tpu.memory_space<vmem>>, vector<1x1x32xf32>
    %125 = vector.shape_cast %124 : vector<1x1x32xf32> to vector<1x32xf32>
    %c0_48 = arith.constant 0 : index
    %c0_49 = arith.constant 0 : index
    %c0_50 = arith.constant 0 : index
    %126 = vector.load %arg9[%c0_48, %c0_49, %c0_50] : memref<2x1x32xf32, #tpu.memory_space<vmem>>, vector<1x1x32xf32>
    %127 = vector.shape_cast %126 : vector<1x1x32xf32> to vector<1x32xf32>
    %cst_51 = arith.constant dense<0.000000e+00> : vector<16xf32>
    %128 = vector.multi_reduction <add>, %123, %cst_51 [1] : vector<16x32xf32> to vector<16xf32>
    %129 = vector.shape_cast %128 : vector<16xf32> to vector<16x1xf32>
    %cst_52 = arith.constant 3.200000e+01 : f32
    %130 = vector.broadcast %cst_52 : f32 to vector<16x1xf32>
    %131 = arith.divf %129, %130 : vector<16x1xf32>
    %132 = vector.broadcast %131 : vector<16x1xf32> to vector<16x32xf32>
    %133 = arith.subf %123, %132 : vector<16x32xf32>
    %134 = arith.mulf %133, %133 : vector<16x32xf32>
    %cst_53 = arith.constant dense<0.000000e+00> : vector<16xf32>
    %135 = vector.multi_reduction <add>, %134, %cst_53 [1] : vector<16x32xf32> to vector<16xf32>
    %136 = vector.shape_cast %135 : vector<16xf32> to vector<16x1xf32>
    %cst_54 = arith.constant 3.200000e+01 : f32
    %137 = vector.broadcast %cst_54 : f32 to vector<16x1xf32>
    %138 = arith.divf %136, %137 : vector<16x1xf32>
    %139 = vector.broadcast %131 : vector<16x1xf32> to vector<16x32xf32>
    %140 = arith.subf %123, %139 : vector<16x32xf32>
    %cst_55 = arith.constant 9.99999996E-13 : f32
    %141 = vector.broadcast %cst_55 : f32 to vector<16x1xf32>
    %142 = arith.addf %138, %141 : vector<16x1xf32>
    %143 = math.rsqrt %142 : vector<16x1xf32>
    %144 = vector.broadcast %143 : vector<16x1xf32> to vector<16x32xf32>
    %145 = arith.mulf %140, %144 : vector<16x32xf32>
    %146 = vector.broadcast %125 : vector<1x32xf32> to vector<16x32xf32>
    %147 = arith.mulf %145, %146 : vector<16x32xf32>
    %148 = vector.broadcast %127 : vector<1x32xf32> to vector<16x32xf32>
    %149 = arith.addf %147, %148 : vector<16x32xf32>
    %c0_56 = arith.constant 0 : index
    %c0_57 = arith.constant 0 : index
    %c0_58 = arith.constant 0 : index
    %150 = vector.load %arg10[%c0_56, %c0_57, %c0_58] : memref<2x32x64xf32, #tpu.memory_space<vmem>>, vector<1x32x64xf32>
    %151 = vector.shape_cast %150 : vector<1x32x64xf32> to vector<32x64xf32>
    %cst_59 = arith.constant dense<0.000000e+00> : vector<16x64xf32>
    %152 = tpu.matmul %149, %151, %cst_59 {dimension_numbers = #tpu.dot_dimension_numbers<[1], [0], [0], [1], [0, 0, 1, 1], [], []>} : vector<16x32xf32>, vector<32x64xf32>, vector<16x64xf32> -> vector<16x64xf32>
    %c0_60 = arith.constant 0 : index
    %c0_61 = arith.constant 0 : index
    %c0_62 = arith.constant 0 : index
    %153 = vector.load %arg11[%c0_60, %c0_61, %c0_62] : memref<2x1x64xf32, #tpu.memory_space<vmem>>, vector<1x1x64xf32>
    %154 = vector.shape_cast %153 : vector<1x1x64xf32> to vector<1x64xf32>
    %155 = vector.broadcast %154 : vector<1x64xf32> to vector<16x64xf32>
    %156 = arith.addf %152, %155 : vector<16x64xf32>
    %cst_63 = arith.constant 5.000000e-01 : f32
    %157 = vector.broadcast %cst_63 : f32 to vector<16x64xf32>
    %158 = arith.mulf %157, %156 : vector<16x64xf32>
    %cst_64 = arith.constant 4.471500e-02 : f32
    %159 = vector.broadcast %cst_64 : f32 to vector<16x64xf32>
    %160 = arith.mulf %159, %156 : vector<16x64xf32>
    %161 = arith.mulf %160, %156 : vector<16x64xf32>
    %162 = arith.mulf %161, %156 : vector<16x64xf32>
    %163 = arith.addf %156, %162 : vector<16x64xf32>
    %cst_65 = arith.constant 0.797884583 : f32
    %164 = vector.broadcast %cst_65 : f32 to vector<16x64xf32>
    %165 = arith.mulf %164, %163 : vector<16x64xf32>
    %166 = math.tanh %165 : vector<16x64xf32>
    %cst_66 = arith.constant 1.000000e+00 : f32
    %167 = vector.broadcast %cst_66 : f32 to vector<16x64xf32>
    %168 = arith.addf %167, %166 : vector<16x64xf32>
    %169 = arith.mulf %158, %168 : vector<16x64xf32>
    %c0_67 = arith.constant 0 : index
    %c0_68 = arith.constant 0 : index
    %c0_69 = arith.constant 0 : index
    %170 = vector.load %arg12[%c0_67, %c0_68, %c0_69] : memref<2x64x32xf32, #tpu.memory_space<vmem>>, vector<1x64x32xf32>
    %171 = vector.shape_cast %170 : vector<1x64x32xf32> to vector<64x32xf32>
    %cst_70 = arith.constant dense<0.000000e+00> : vector<16x32xf32>
    %172 = tpu.matmul %169, %171, %cst_70 {dimension_numbers = #tpu.dot_dimension_numbers<[1], [0], [0], [1], [0, 0, 1, 1], [], []>} : vector<16x64xf32>, vector<64x32xf32>, vector<16x32xf32> -> vector<16x32xf32>
    %c0_71 = arith.constant 0 : index
    %c0_72 = arith.constant 0 : index
    %c0_73 = arith.constant 0 : index
    %173 = vector.load %arg13[%c0_71, %c0_72, %c0_73] : memref<2x1x32xf32, #tpu.memory_space<vmem>>, vector<1x1x32xf32>
    %174 = vector.shape_cast %173 : vector<1x1x32xf32> to vector<1x32xf32>
    %175 = vector.broadcast %174 : vector<1x32xf32> to vector<16x32xf32>
    %176 = arith.addf %172, %175 : vector<16x32xf32>
    %177 = arith.addf %176, %149 : vector<16x32xf32>
    %c0_74 = arith.constant 0 : index
    %c0_75 = arith.constant 0 : index
    %c0_76 = arith.constant 0 : index
    %178 = vector.load %arg14[%c0_74, %c0_75, %c0_76] : memref<2x1x32xf32, #tpu.memory_space<vmem>>, vector<1x1x32xf32>
    %179 = vector.shape_cast %178 : vector<1x1x32xf32> to vector<1x32xf32>
    %c0_77 = arith.constant 0 : index
    %c0_78 = arith.constant 0 : index
    %c0_79 = arith.constant 0 : index
    %180 = vector.load %arg15[%c0_77, %c0_78, %c0_79] : memref<2x1x32xf32, #tpu.memory_space<vmem>>, vector<1x1x32xf32>
    %181 = vector.shape_cast %180 : vector<1x1x32xf32> to vector<1x32xf32>
    %cst_80 = arith.constant dense<0.000000e+00> : vector<16xf32>
    %182 = vector.multi_reduction <add>, %177, %cst_80 [1] : vector<16x32xf32> to vector<16xf32>
    %183 = vector.shape_cast %182 : vector<16xf32> to vector<16x1xf32>
    %cst_81 = arith.constant 3.200000e+01 : f32
    %184 = vector.broadcast %cst_81 : f32 to vector<16x1xf32>
    %185 = arith.divf %183, %184 : vector<16x1xf32>
    %186 = vector.broadcast %185 : vector<16x1xf32> to vector<16x32xf32>
    %187 = arith.subf %177, %186 : vector<16x32xf32>
    %188 = arith.mulf %187, %187 : vector<16x32xf32>
    %cst_82 = arith.constant dense<0.000000e+00> : vector<16xf32>
    %189 = vector.multi_reduction <add>, %188, %cst_82 [1] : vector<16x32xf32> to vector<16xf32>
    %190 = vector.shape_cast %189 : vector<16xf32> to vector<16x1xf32>
    %cst_83 = arith.constant 3.200000e+01 : f32
    %191 = vector.broadcast %cst_83 : f32 to vector<16x1xf32>
    %192 = arith.divf %190, %191 : vector<16x1xf32>
    %193 = vector.broadcast %185 : vector<16x1xf32> to vector<16x32xf32>
    %194 = arith.subf %177, %193 : vector<16x32xf32>
    %cst_84 = arith.constant 9.99999996E-13 : f32
    %195 = vector.broadcast %cst_84 : f32 to vector<16x1xf32>
    %196 = arith.addf %192, %195 : vector<16x1xf32>
    %197 = math.rsqrt %196 : vector<16x1xf32>
    %198 = vector.broadcast %197 : vector<16x1xf32> to vector<16x32xf32>
    %199 = arith.mulf %194, %198 : vector<16x32xf32>
    %200 = vector.broadcast %179 : vector<1x32xf32> to vector<16x32xf32>
    %201 = arith.mulf %199, %200 : vector<16x32xf32>
    %202 = vector.broadcast %181 : vector<1x32xf32> to vector<16x32xf32>
    %203 = arith.addf %201, %202 : vector<16x32xf32>
    %c1 = arith.constant 1 : index
    %c0_85 = arith.constant 0 : index
    %c0_86 = arith.constant 0 : index
    %204 = vector.load %arg4[%c1, %c0_85, %c0_86] : memref<2x32x96xf32, #tpu.memory_space<vmem>>, vector<1x32x96xf32>
    %205 = vector.shape_cast %204 : vector<1x32x96xf32> to vector<32x96xf32>
    %cst_87 = arith.constant dense<0.000000e+00> : vector<16x96xf32>
    %206 = tpu.matmul %203, %205, %cst_87 {dimension_numbers = #tpu.dot_dimension_numbers<[1], [0], [0], [1], [0, 0, 1, 1], [], []>} : vector<16x32xf32>, vector<32x96xf32>, vector<16x96xf32> -> vector<16x96xf32>
    %c1_88 = arith.constant 1 : index
    %c0_89 = arith.constant 0 : index
    %c0_90 = arith.constant 0 : index
    %207 = vector.load %arg5[%c1_88, %c0_89, %c0_90] : memref<2x1x96xf32, #tpu.memory_space<vmem>>, vector<1x1x96xf32>
    %208 = vector.shape_cast %207 : vector<1x1x96xf32> to vector<1x96xf32>
    %209 = vector.broadcast %208 : vector<1x96xf32> to vector<16x96xf32>
    %210 = arith.addf %206, %209 : vector<16x96xf32>
    %211 = vector.extract_strided_slice %210 {offsets = [0, 0], sizes = [8, 96], strides = [1, 1]} : vector<16x96xf32> to vector<8x96xf32>
    %212 = vector.extract_strided_slice %25 {offsets = [0, 0], sizes = [1, 8], strides = [1, 1]} : vector<2x8xf32> to vector<1x8xf32>
    %213 = vector.extract_strided_slice %211 {offsets = [0, 0], sizes = [8, 16], strides = [1, 1]} : vector<8x96xf32> to vector<8x16xf32>
    %214 = vector.extract_strided_slice %211 {offsets = [0, 32], sizes = [8, 16], strides = [1, 1]} : vector<8x96xf32> to vector<8x16xf32>
    %215 = vector.extract_strided_slice %211 {offsets = [0, 64], sizes = [8, 16], strides = [1, 1]} : vector<8x96xf32> to vector<8x16xf32>
    %cst_91 = arith.constant dense<0.000000e+00> : vector<8x8xf32>
    %216 = tpu.matmul %213, %214, %cst_91 {dimension_numbers = #tpu.dot_dimension_numbers<[1], [1], [0], [0], [0, 0, 1, 0], [], []>} : vector<8x16xf32>, vector<8x16xf32>, vector<8x8xf32> -> vector<8x8xf32>
    %cst_92 = arith.constant 2.500000e-01 : f32
    %217 = vector.broadcast %cst_92 : f32 to vector<8x8xf32>
    %218 = arith.mulf %216, %217 : vector<8x8xf32>
    %219 = vector.broadcast %212 : vector<1x8xf32> to vector<8x8xf32>
    %220 = arith.addf %218, %219 : vector<8x8xf32>
    %cst_93 = arith.constant dense<0xFF800000> : vector<8xf32>
    %221 = vector.multi_reduction <maximumf>, %220, %cst_93 [1] : vector<8x8xf32> to vector<8xf32>
    %222 = vector.shape_cast %221 : vector<8xf32> to vector<8x1xf32>
    %223 = vector.broadcast %222 : vector<8x1xf32> to vector<8x8xf32>
    %224 = arith.subf %220, %223 : vector<8x8xf32>
    %225 = math.exp %224 : vector<8x8xf32>
    %cst_94 = arith.constant dense<0.000000e+00> : vector<8xf32>
    %226 = vector.multi_reduction <add>, %225, %cst_94 [1] : vector<8x8xf32> to vector<8xf32>
    %227 = vector.shape_cast %226 : vector<8xf32> to vector<8x1xf32>
    %228 = tpu.reciprocal %227 {approx = true} : vector<8x1xf32> -> vector<8x1xf32>
    %229 = vector.broadcast %228 : vector<8x1xf32> to vector<8x8xf32>
    %230 = arith.mulf %225, %229 : vector<8x8xf32>
    %cst_95 = arith.constant dense<0.000000e+00> : vector<8x16xf32>
    %231 = tpu.matmul %230, %215, %cst_95 {dimension_numbers = #tpu.dot_dimension_numbers<[1], [0], [0], [1], [0, 0, 1, 1], [], []>} : vector<8x8xf32>, vector<8x16xf32>, vector<8x16xf32> -> vector<8x16xf32>
    %232 = vector.extract_strided_slice %211 {offsets = [0, 16], sizes = [8, 16], strides = [1, 1]} : vector<8x96xf32> to vector<8x16xf32>
    %233 = vector.extract_strided_slice %211 {offsets = [0, 48], sizes = [8, 16], strides = [1, 1]} : vector<8x96xf32> to vector<8x16xf32>
    %234 = vector.extract_strided_slice %211 {offsets = [0, 80], sizes = [8, 16], strides = [1, 1]} : vector<8x96xf32> to vector<8x16xf32>
    %cst_96 = arith.constant dense<0.000000e+00> : vector<8x8xf32>
    %235 = tpu.matmul %232, %233, %cst_96 {dimension_numbers = #tpu.dot_dimension_numbers<[1], [1], [0], [0], [0, 0, 1, 0], [], []>} : vector<8x16xf32>, vector<8x16xf32>, vector<8x8xf32> -> vector<8x8xf32>
    %cst_97 = arith.constant 2.500000e-01 : f32
    %236 = vector.broadcast %cst_97 : f32 to vector<8x8xf32>
    %237 = arith.mulf %235, %236 : vector<8x8xf32>
    %238 = vector.broadcast %212 : vector<1x8xf32> to vector<8x8xf32>
    %239 = arith.addf %237, %238 : vector<8x8xf32>
    %cst_98 = arith.constant dense<0xFF800000> : vector<8xf32>
    %240 = vector.multi_reduction <maximumf>, %239, %cst_98 [1] : vector<8x8xf32> to vector<8xf32>
    %241 = vector.shape_cast %240 : vector<8xf32> to vector<8x1xf32>
    %242 = vector.broadcast %241 : vector<8x1xf32> to vector<8x8xf32>
    %243 = arith.subf %239, %242 : vector<8x8xf32>
    %244 = math.exp %243 : vector<8x8xf32>
    %cst_99 = arith.constant dense<0.000000e+00> : vector<8xf32>
    %245 = vector.multi_reduction <add>, %244, %cst_99 [1] : vector<8x8xf32> to vector<8xf32>
    %246 = vector.shape_cast %245 : vector<8xf32> to vector<8x1xf32>
    %247 = tpu.reciprocal %246 {approx = true} : vector<8x1xf32> -> vector<8x1xf32>
    %248 = vector.broadcast %247 : vector<8x1xf32> to vector<8x8xf32>
    %249 = arith.mulf %244, %248 : vector<8x8xf32>
    %cst_100 = arith.constant dense<0.000000e+00> : vector<8x16xf32>
    %250 = tpu.matmul %249, %234, %cst_100 {dimension_numbers = #tpu.dot_dimension_numbers<[1], [0], [0], [1], [0, 0, 1, 1], [], []>} : vector<8x8xf32>, vector<8x16xf32>, vector<8x16xf32> -> vector<8x16xf32>
    %251 = tpu.concatenate %231, %250 in 1 : vector<8x16xf32>, vector<8x16xf32> -> vector<8x32xf32>
    %252 = vector.extract_strided_slice %210 {offsets = [8, 0], sizes = [8, 96], strides = [1, 1]} : vector<16x96xf32> to vector<8x96xf32>
    %253 = vector.extract_strided_slice %25 {offsets = [1, 0], sizes = [1, 8], strides = [1, 1]} : vector<2x8xf32> to vector<1x8xf32>
    %254 = vector.extract_strided_slice %252 {offsets = [0, 0], sizes = [8, 16], strides = [1, 1]} : vector<8x96xf32> to vector<8x16xf32>
    %255 = vector.extract_strided_slice %252 {offsets = [0, 32], sizes = [8, 16], strides = [1, 1]} : vector<8x96xf32> to vector<8x16xf32>
    %256 = vector.extract_strided_slice %252 {offsets = [0, 64], sizes = [8, 16], strides = [1, 1]} : vector<8x96xf32> to vector<8x16xf32>
    %cst_101 = arith.constant dense<0.000000e+00> : vector<8x8xf32>
    %257 = tpu.matmul %254, %255, %cst_101 {dimension_numbers = #tpu.dot_dimension_numbers<[1], [1], [0], [0], [0, 0, 1, 0], [], []>} : vector<8x16xf32>, vector<8x16xf32>, vector<8x8xf32> -> vector<8x8xf32>
    %cst_102 = arith.constant 2.500000e-01 : f32
    %258 = vector.broadcast %cst_102 : f32 to vector<8x8xf32>
    %259 = arith.mulf %257, %258 : vector<8x8xf32>
    %260 = vector.broadcast %253 : vector<1x8xf32> to vector<8x8xf32>
    %261 = arith.addf %259, %260 : vector<8x8xf32>
    %cst_103 = arith.constant dense<0xFF800000> : vector<8xf32>
    %262 = vector.multi_reduction <maximumf>, %261, %cst_103 [1] : vector<8x8xf32> to vector<8xf32>
    %263 = vector.shape_cast %262 : vector<8xf32> to vector<8x1xf32>
    %264 = vector.broadcast %263 : vector<8x1xf32> to vector<8x8xf32>
    %265 = arith.subf %261, %264 : vector<8x8xf32>
    %266 = math.exp %265 : vector<8x8xf32>
    %cst_104 = arith.constant dense<0.000000e+00> : vector<8xf32>
    %267 = vector.multi_reduction <add>, %266, %cst_104 [1] : vector<8x8xf32> to vector<8xf32>
    %268 = vector.shape_cast %267 : vector<8xf32> to vector<8x1xf32>
    %269 = tpu.reciprocal %268 {approx = true} : vector<8x1xf32> -> vector<8x1xf32>
    %270 = vector.broadcast %269 : vector<8x1xf32> to vector<8x8xf32>
    %271 = arith.mulf %266, %270 : vector<8x8xf32>
    %cst_105 = arith.constant dense<0.000000e+00> : vector<8x16xf32>
    %272 = tpu.matmul %271, %256, %cst_105 {dimension_numbers = #tpu.dot_dimension_numbers<[1], [0], [0], [1], [0, 0, 1, 1], [], []>} : vector<8x8xf32>, vector<8x16xf32>, vector<8x16xf32> -> vector<8x16xf32>
    %273 = vector.extract_strided_slice %252 {offsets = [0, 16], sizes = [8, 16], strides = [1, 1]} : vector<8x96xf32> to vector<8x16xf32>
    %274 = vector.extract_strided_slice %252 {offsets = [0, 48], sizes = [8, 16], strides = [1, 1]} : vector<8x96xf32> to vector<8x16xf32>
    %275 = vector.extract_strided_slice %252 {offsets = [0, 80], sizes = [8, 16], strides = [1, 1]} : vector<8x96xf32> to vector<8x16xf32>
    %cst_106 = arith.constant dense<0.000000e+00> : vector<8x8xf32>
    %276 = tpu.matmul %273, %274, %cst_106 {dimension_numbers = #tpu.dot_dimension_numbers<[1], [1], [0], [0], [0, 0, 1, 0], [], []>} : vector<8x16xf32>, vector<8x16xf32>, vector<8x8xf32> -> vector<8x8xf32>
    %cst_107 = arith.constant 2.500000e-01 : f32
    %277 = vector.broadcast %cst_107 : f32 to vector<8x8xf32>
    %278 = arith.mulf %276, %277 : vector<8x8xf32>
    %279 = vector.broadcast %253 : vector<1x8xf32> to vector<8x8xf32>
    %280 = arith.addf %278, %279 : vector<8x8xf32>
    %cst_108 = arith.constant dense<0xFF800000> : vector<8xf32>
    %281 = vector.multi_reduction <maximumf>, %280, %cst_108 [1] : vector<8x8xf32> to vector<8xf32>
    %282 = vector.shape_cast %281 : vector<8xf32> to vector<8x1xf32>
    %283 = vector.broadcast %282 : vector<8x1xf32> to vector<8x8xf32>
    %284 = arith.subf %280, %283 : vector<8x8xf32>
    %285 = math.exp %284 : vector<8x8xf32>
    %cst_109 = arith.constant dense<0.000000e+00> : vector<8xf32>
    %286 = vector.multi_reduction <add>, %285, %cst_109 [1] : vector<8x8xf32> to vector<8xf32>
    %287 = vector.shape_cast %286 : vector<8xf32> to vector<8x1xf32>
    %288 = tpu.reciprocal %287 {approx = true} : vector<8x1xf32> -> vector<8x1xf32>
    %289 = vector.broadcast %288 : vector<8x1xf32> to vector<8x8xf32>
    %290 = arith.mulf %285, %289 : vector<8x8xf32>
    %cst_110 = arith.constant dense<0.000000e+00> : vector<8x16xf32>
    %291 = tpu.matmul %290, %275, %cst_110 {dimension_numbers = #tpu.dot_dimension_numbers<[1], [0], [0], [1], [0, 0, 1, 1], [], []>} : vector<8x8xf32>, vector<8x16xf32>, vector<8x16xf32> -> vector<8x16xf32>
    %292 = tpu.concatenate %272, %291 in 1 : vector<8x16xf32>, vector<8x16xf32> -> vector<8x32xf32>
    %293 = tpu.concatenate %251, %292 in 0 : vector<8x32xf32>, vector<8x32xf32> -> vector<16x32xf32>
    %c1_111 = arith.constant 1 : index
    %c0_112 = arith.constant 0 : index
    %c0_113 = arith.constant 0 : index
    %294 = vector.load %arg6[%c1_111, %c0_112, %c0_113] : memref<2x32x32xf32, #tpu.memory_space<vmem>>, vector<1x32x32xf32>
    %295 = vector.shape_cast %294 : vector<1x32x32xf32> to vector<32x32xf32>
    %cst_114 = arith.constant dense<0.000000e+00> : vector<16x32xf32>
    %296 = tpu.matmul %293, %295, %cst_114 {dimension_numbers = #tpu.dot_dimension_numbers<[1], [0], [0], [1], [0, 0, 1, 1], [], []>} : vector<16x32xf32>, vector<32x32xf32>, vector<16x32xf32> -> vector<16x32xf32>
    %c1_115 = arith.constant 1 : index
    %c0_116 = arith.constant 0 : index
    %c0_117 = arith.constant 0 : index
    %297 = vector.load %arg7[%c1_115, %c0_116, %c0_117] : memref<2x1x32xf32, #tpu.memory_space<vmem>>, vector<1x1x32xf32>
    %298 = vector.shape_cast %297 : vector<1x1x32xf32> to vector<1x32xf32>
    %299 = vector.broadcast %298 : vector<1x32xf32> to vector<16x32xf32>
    %300 = arith.addf %296, %299 : vector<16x32xf32>
    %301 = arith.addf %300, %203 : vector<16x32xf32>
    %c1_118 = arith.constant 1 : index
    %c0_119 = arith.constant 0 : index
    %c0_120 = arith.constant 0 : index
    %302 = vector.load %arg8[%c1_118, %c0_119, %c0_120] : memref<2x1x32xf32, #tpu.memory_space<vmem>>, vector<1x1x32xf32>
    %303 = vector.shape_cast %302 : vector<1x1x32xf32> to vector<1x32xf32>
    %c1_121 = arith.constant 1 : index
    %c0_122 = arith.constant 0 : index
    %c0_123 = arith.constant 0 : index
    %304 = vector.load %arg9[%c1_121, %c0_122, %c0_123] : memref<2x1x32xf32, #tpu.memory_space<vmem>>, vector<1x1x32xf32>
    %305 = vector.shape_cast %304 : vector<1x1x32xf32> to vector<1x32xf32>
    %cst_124 = arith.constant dense<0.000000e+00> : vector<16xf32>
    %306 = vector.multi_reduction <add>, %301, %cst_124 [1] : vector<16x32xf32> to vector<16xf32>
    %307 = vector.shape_cast %306 : vector<16xf32> to vector<16x1xf32>
    %cst_125 = arith.constant 3.200000e+01 : f32
    %308 = vector.broadcast %cst_125 : f32 to vector<16x1xf32>
    %309 = arith.divf %307, %308 : vector<16x1xf32>
    %310 = vector.broadcast %309 : vector<16x1xf32> to vector<16x32xf32>
    %311 = arith.subf %301, %310 : vector<16x32xf32>
    %312 = arith.mulf %311, %311 : vector<16x32xf32>
    %cst_126 = arith.constant dense<0.000000e+00> : vector<16xf32>
    %313 = vector.multi_reduction <add>, %312, %cst_126 [1] : vector<16x32xf32> to vector<16xf32>
    %314 = vector.shape_cast %313 : vector<16xf32> to vector<16x1xf32>
    %cst_127 = arith.constant 3.200000e+01 : f32
    %315 = vector.broadcast %cst_127 : f32 to vector<16x1xf32>
    %316 = arith.divf %314, %315 : vector<16x1xf32>
    %317 = vector.broadcast %309 : vector<16x1xf32> to vector<16x32xf32>
    %318 = arith.subf %301, %317 : vector<16x32xf32>
    %cst_128 = arith.constant 9.99999996E-13 : f32
    %319 = vector.broadcast %cst_128 : f32 to vector<16x1xf32>
    %320 = arith.addf %316, %319 : vector<16x1xf32>
    %321 = math.rsqrt %320 : vector<16x1xf32>
    %322 = vector.broadcast %321 : vector<16x1xf32> to vector<16x32xf32>
    %323 = arith.mulf %318, %322 : vector<16x32xf32>
    %324 = vector.broadcast %303 : vector<1x32xf32> to vector<16x32xf32>
    %325 = arith.mulf %323, %324 : vector<16x32xf32>
    %326 = vector.broadcast %305 : vector<1x32xf32> to vector<16x32xf32>
    %327 = arith.addf %325, %326 : vector<16x32xf32>
    %c1_129 = arith.constant 1 : index
    %c0_130 = arith.constant 0 : index
    %c0_131 = arith.constant 0 : index
    %328 = vector.load %arg10[%c1_129, %c0_130, %c0_131] : memref<2x32x64xf32, #tpu.memory_space<vmem>>, vector<1x32x64xf32>
    %329 = vector.shape_cast %328 : vector<1x32x64xf32> to vector<32x64xf32>
    %cst_132 = arith.constant dense<0.000000e+00> : vector<16x64xf32>
    %330 = tpu.matmul %327, %329, %cst_132 {dimension_numbers = #tpu.dot_dimension_numbers<[1], [0], [0], [1], [0, 0, 1, 1], [], []>} : vector<16x32xf32>, vector<32x64xf32>, vector<16x64xf32> -> vector<16x64xf32>
    %c1_133 = arith.constant 1 : index
    %c0_134 = arith.constant 0 : index
    %c0_135 = arith.constant 0 : index
    %331 = vector.load %arg11[%c1_133, %c0_134, %c0_135] : memref<2x1x64xf32, #tpu.memory_space<vmem>>, vector<1x1x64xf32>
    %332 = vector.shape_cast %331 : vector<1x1x64xf32> to vector<1x64xf32>
    %333 = vector.broadcast %332 : vector<1x64xf32> to vector<16x64xf32>
    %334 = arith.addf %330, %333 : vector<16x64xf32>
    %cst_136 = arith.constant 5.000000e-01 : f32
    %335 = vector.broadcast %cst_136 : f32 to vector<16x64xf32>
    %336 = arith.mulf %335, %334 : vector<16x64xf32>
    %cst_137 = arith.constant 4.471500e-02 : f32
    %337 = vector.broadcast %cst_137 : f32 to vector<16x64xf32>
    %338 = arith.mulf %337, %334 : vector<16x64xf32>
    %339 = arith.mulf %338, %334 : vector<16x64xf32>
    %340 = arith.mulf %339, %334 : vector<16x64xf32>
    %341 = arith.addf %334, %340 : vector<16x64xf32>
    %cst_138 = arith.constant 0.797884583 : f32
    %342 = vector.broadcast %cst_138 : f32 to vector<16x64xf32>
    %343 = arith.mulf %342, %341 : vector<16x64xf32>
    %344 = math.tanh %343 : vector<16x64xf32>
    %cst_139 = arith.constant 1.000000e+00 : f32
    %345 = vector.broadcast %cst_139 : f32 to vector<16x64xf32>
    %346 = arith.addf %345, %344 : vector<16x64xf32>
    %347 = arith.mulf %336, %346 : vector<16x64xf32>
    %c1_140 = arith.constant 1 : index
    %c0_141 = arith.constant 0 : index
    %c0_142 = arith.constant 0 : index
    %348 = vector.load %arg12[%c1_140, %c0_141, %c0_142] : memref<2x64x32xf32, #tpu.memory_space<vmem>>, vector<1x64x32xf32>
    %349 = vector.shape_cast %348 : vector<1x64x32xf32> to vector<64x32xf32>
    %cst_143 = arith.constant dense<0.000000e+00> : vector<16x32xf32>
    %350 = tpu.matmul %347, %349, %cst_143 {dimension_numbers = #tpu.dot_dimension_numbers<[1], [0], [0], [1], [0, 0, 1, 1], [], []>} : vector<16x64xf32>, vector<64x32xf32>, vector<16x32xf32> -> vector<16x32xf32>
    %c1_144 = arith.constant 1 : index
    %c0_145 = arith.constant 0 : index
    %c0_146 = arith.constant 0 : index
    %351 = vector.load %arg13[%c1_144, %c0_145, %c0_146] : memref<2x1x32xf32, #tpu.memory_space<vmem>>, vector<1x1x32xf32>
    %352 = vector.shape_cast %351 : vector<1x1x32xf32> to vector<1x32xf32>
    %353 = vector.broadcast %352 : vector<1x32xf32> to vector<16x32xf32>
    %354 = arith.addf %350, %353 : vector<16x32xf32>
    %355 = arith.addf %354, %327 : vector<16x32xf32>
    %c1_147 = arith.constant 1 : index
    %c0_148 = arith.constant 0 : index
    %c0_149 = arith.constant 0 : index
    %356 = vector.load %arg14[%c1_147, %c0_148, %c0_149] : memref<2x1x32xf32, #tpu.memory_space<vmem>>, vector<1x1x32xf32>
    %357 = vector.shape_cast %356 : vector<1x1x32xf32> to vector<1x32xf32>
    %c1_150 = arith.constant 1 : index
    %c0_151 = arith.constant 0 : index
    %c0_152 = arith.constant 0 : index
    %358 = vector.load %arg15[%c1_150, %c0_151, %c0_152] : memref<2x1x32xf32, #tpu.memory_space<vmem>>, vector<1x1x32xf32>
    %359 = vector.shape_cast %358 : vector<1x1x32xf32> to vector<1x32xf32>
    %cst_153 = arith.constant dense<0.000000e+00> : vector<16xf32>
    %360 = vector.multi_reduction <add>, %355, %cst_153 [1] : vector<16x32xf32> to vector<16xf32>
    %361 = vector.shape_cast %360 : vector<16xf32> to vector<16x1xf32>
    %cst_154 = arith.constant 3.200000e+01 : f32
    %362 = vector.broadcast %cst_154 : f32 to vector<16x1xf32>
    %363 = arith.divf %361, %362 : vector<16x1xf32>
    %364 = vector.broadcast %363 : vector<16x1xf32> to vector<16x32xf32>
    %365 = arith.subf %355, %364 : vector<16x32xf32>
    %366 = arith.mulf %365, %365 : vector<16x32xf32>
    %cst_155 = arith.constant dense<0.000000e+00> : vector<16xf32>
    %367 = vector.multi_reduction <add>, %366, %cst_155 [1] : vector<16x32xf32> to vector<16xf32>
    %368 = vector.shape_cast %367 : vector<16xf32> to vector<16x1xf32>
    %cst_156 = arith.constant 3.200000e+01 : f32
    %369 = vector.broadcast %cst_156 : f32 to vector<16x1xf32>
    %370 = arith.divf %368, %369 : vector<16x1xf32>
    %371 = vector.broadcast %363 : vector<16x1xf32> to vector<16x32xf32>
    %372 = arith.subf %355, %371 : vector<16x32xf32>
    %cst_157 = arith.constant 9.99999996E-13 : f32
    %373 = vector.broadcast %cst_157 : f32 to vector<16x1xf32>
    %374 = arith.addf %370, %373 : vector<16x1xf32>
    %375 = math.rsqrt %374 : vector<16x1xf32>
    %376 = vector.broadcast %375 : vector<16x1xf32> to vector<16x32xf32>
    %377 = arith.mulf %372, %376 : vector<16x32xf32>
    %378 = vector.broadcast %357 : vector<1x32xf32> to vector<16x32xf32>
    %379 = arith.mulf %377, %378 : vector<16x32xf32>
    %380 = vector.broadcast %359 : vector<1x32xf32> to vector<16x32xf32>
    %381 = arith.addf %379, %380 : vector<16x32xf32>
    %382 = vector.extract_strided_slice %381 {offsets = [0, 0], sizes = [1, 32], strides = [1, 1]} : vector<16x32xf32> to vector<1x32xf32>
    %383 = vector.extract_strided_slice %381 {offsets = [8, 0], sizes = [1, 32], strides = [1, 1]} : vector<16x32xf32> to vector<1x32xf32>
    %384 = tpu.concatenate %382, %383 in 0 : vector<1x32xf32>, vector<1x32xf32> -> vector<2x32xf32>
    %c0_158 = arith.constant 0 : index
    %c0_159 = arith.constant 0 : index
    %385 = vector.load %arg16[%c0_158, %c0_159] : memref<32x32xf32, #tpu.memory_space<vmem>>, vector<32x32xf32>
    %cst_160 = arith.constant dense<0.000000e+00> : vector<2x32xf32>
    %386 = tpu.matmul %384, %385, %cst_160 {dimension_numbers = #tpu.dot_dimension_numbers<[1], [0], [0], [1], [0, 0, 1, 1], [], []>} : vector<2x32xf32>, vector<32x32xf32>, vector<2x32xf32> -> vector<2x32xf32>
    %c0_161 = arith.constant 0 : index
    %c0_162 = arith.constant 0 : index
    %387 = vector.load %arg17[%c0_161, %c0_162] : memref<1x32xf32, #tpu.memory_space<vmem>>, vector<1x32xf32>
    %388 = vector.broadcast %387 : vector<1x32xf32> to vector<2x32xf32>
    %389 = arith.addf %386, %388 : vector<2x32xf32>
    %390 = math.tanh %389 : vector<2x32xf32>
    %c0_163 = arith.constant 0 : index
    %c0_164 = arith.constant 0 : index
    %391 = vector.load %arg18[%c0_163, %c0_164] : memref<32x3xf32, #tpu.memory_space<vmem>>, vector<32x3xf32>
    %cst_165 = arith.constant dense<0.000000e+00> : vector<2x3xf32>
    %392 = tpu.matmul %390, %391, %cst_165 {dimension_numbers = #tpu.dot_dimension_numbers<[1], [0], [0], [1], [0, 0, 1, 1], [], []>} : vector<2x32xf32>, vector<32x3xf32>, vector<2x3xf32> -> vector<2x3xf32>
    %c0_166 = arith.constant 0 : index
    %c0_167 = arith.constant 0 : index
    %393 = vector.load %arg19[%c0_166, %c0_167] : memref<1x3xf32, #tpu.memory_space<vmem>>, vector<1x3xf32>
    %394 = vector.broadcast %393 : vector<1x3xf32> to vector<2x3xf32>
    %395 = arith.addf %392, %394 : vector<2x3xf32>
    %c0_168 = arith.constant 0 : index
    %c0_169 = arith.constant 0 : index
    %396 = vector.load %arg20[%c0_168, %c0_169] : memref<2x3xf32, #tpu.memory_space<vmem>>, vector<2x3xf32>
    tpu.vector_store %arg20[%c0_168, %c0_169], %395 {strides = array<i32>} : memref<2x3xf32, #tpu.memory_space<vmem>>, vector<2x3xf32>,
    return
  }
}

</mosaic_0001>

<bundles_post_ra>
// kernel: _lambda_.1
= control target key start
LH: loop header
LB: loop body
LE: loop exit
PB: predicated region body
PF: predicated region fallthrough
CT: control target
= control target key end

     0   :  { %s2120_s0 = inlined_call_operand.vmem [shape: f32[16,32], index: 0, kind: input, shape index: {}]   ;;  %s2121_s1 = inlined_call_operand.vmem [shape: f32[2,8], index: 1, kind: input, shape index: {}]   ;;  %s2122_s2 = inlined_call_operand.vmem [shape: f32[1,32], index: 2, kind: input, shape index: {}]   ;;  %s2123_s3 = inlined_call_operand.vmem [shape: f32[1,32], index: 3, kind: input, shape index: {}, may-alias: {3,17}]   ;;  %s2124_s4 = inlined_call_operand.vmem [shape: f32[2,32,96], index: 4, kind: input, shape index: {}]   ;;  %s2125_s5 = inlined_call_operand.vmem [shape: f32[2,1,96], index: 5, kind: input, shape index: {}]   ;;  %s2126_s6 = inlined_call_operand.vmem [shape: f32[2,32,32], index: 6, kind: input, shape index: {}]   ;;  %s2127_s7 = inlined_call_operand.vmem [shape: f32[2,1,32], index: 7, kind: input, shape index: {}, may-alias: {7,9,13,15}]   ;;  %s2128_s8 = inlined_call_operand.vmem [shape: f32[2,1,32], index: 8, kind: input, shape index: {}, may-alias: {8,14}]   ;;  %s2129_s9 = inlined_call_operand.vmem [shape: f32[2,1,32], index: 9, kind: input, shape index: {}, may-alias: {7,9,13,15}]   ;;  %s2130_s10 = inlined_call_operand.vmem [shape: f32[2,32,64], index: 10, kind: input, shape index: {}]   ;;  %s2131_s11 = inlined_call_operand.vmem [shape: f32[2,1,64], index: 11, kind: input, shape index: {}]   ;;  %s2132_s12 = inlined_call_operand.vmem [shape: f32[2,64,32], index: 12, kind: input, shape index: {}]   ;;  %s2133_s13 = inlined_call_operand.vmem [shape: f32[2,1,32], index: 13, kind: input, shape index: {}, may-alias: {7,9,13,15}]   ;;  %s2134_s14 = inlined_call_operand.vmem [shape: f32[2,1,32], index: 14, kind: input, shape index: {}, may-alias: {8,14}]   ;;  %s2135_s15 = inlined_call_operand.vmem [shape: f32[2,1,32], index: 15, kind: input, shape index: {}, may-alias: {7,9,13,15}]   ;;  %s2136_s16 = inlined_call_operand.vmem [shape: f32[32,32], index: 16, kind: input, shape index: {}]   ;;  %s2137_s17 = inlined_call_operand.vmem [shape: f32[1,32], index: 17, kind: input, shape index: {}, may-alias: {3,17}]   ;;  %s2138_s18 = inlined_call_operand.hbm [shape: f32[32,3], index: 18, kind: input, shape index: {}]   ;;  %s2139_s19 = inlined_call_operand.vmem [shape: f32[1,3], index: 19, kind: input, shape index: {}]   ;;  %s2140_s20 = inlined_call_operand.hbm [shape: f32[2,3], index: 20, kind: output, shape index: {}]  }
   0x1   :  { %2145 = sst [smem:[#allocation8_spill]] %s2120_s0 }
   0x2   :  { %2146 = sst [smem:[#allocation9_spill]] %s2121_s1 }
   0x3   :  { %2147 = sst [smem:[#allocation10_spill]] %s2122_s2 }
   0x4   :  { %2148 = sst [smem:[#allocation11_spill]] %s2123_s3 }
   0x5   :  { %2149 = sst [smem:[#allocation12_spill]] %s2124_s4 }
   0x6   :  { %25 = vsyncpa [#allocation3], 0 }
   0x7   :  { %26 = vsyncpa [#allocation4], 0  ;;  %s67_s23 = sshll.u32 %s2138_s18, 4  ;;  %s1594_s24 = smov [#allocation2]   ;;  %s68_s23 = int_to_ptr.hbm [resolvable:$true] %s67_s23 }
   0x8   :  { %s69_s2 = sshll.u32 %s1594_s24, 4  ;;  %s1595_s25 = smov 128   ;;  %s70_s2 = int_to_ptr.vmem [resolvable:$true] %s69_s2 }
   0x9   :  { %s1596_s3 = smov 8  }
   0xa   :  { %75 = dma.hbm_to_vmem [thread:$0]  %s68_s23, 512, %s70_s2, [#allocation3], %s1595_s25, %s1595_s25, %s1596_s3  }
   0xb   :  { %1590 = dma.done.wait [#allocation3], 512  }
   0xc   :  { %1591 = vsyncadd [#allocation3], 4294966784  ;;  %vm86_vm0 = vcmask 261120   ;;  %s2150_s28 = sld [smem:[#allocation8_spill]]  ;;  %v1597_v4 = vmov 32.0   ;;  %s1598_s30 = smov 112  }
   0xd   :  { %1478 = vrcp.f32 %v1597_v4  ;;  %s2151_s0 = sld [smem:[#allocation12_spill]]  ;;  %v1460_v53 = vld [vmem:[%s2125_s5] ss:$0 sm:$0xff]  ;;  %s1599_s21 = smov 96   ;;  %vm189_vm8 = vcmask 130048   ;;  %vm217_vm9 = vcmask 64512  }
   0xe   :  { %s2152_s26 = sld [smem:[#allocation10_spill]]  ;;  %s1600_s1 = smov 80   ;;  %vm628_vm13 = vcmask 523264  }
   0xf   :  { %s2153_s4 = sld [smem:[#allocation11_spill]]  ;;  %s1601_s2 = smov 64  }
  0x10   :  { %s2154_s24 = sld [smem:[#allocation9_spill]]  ;;  %s1602_s25 = smov 48  }
  0x11   :  { %s2143_s3 = smov 16  }
  0x12   :  { %v82_v0 = vld [vmem:[%s2150_s28] sm:$0xff]  ;;  %v83_v1 = vld [vmem:[%s2150_s28 + $0x8] sm:$0xff] }
  0x13   :  { %v87_v2 = vsel %vm86_vm0, %v82_v0, 0.0  ;;  %v90_v3 = vsel %vm86_vm0, %v83_v1, 0.0  ;;  %v1479_v5 = vpop.eup %1478  ;;  %v152_v21 = vld [vmem:[%s2151_s0 + $0x18] sm:$0xff]  ;;  %v151_v22 = vld [vmem:[%s2151_s0 + $0x10] sm:$0xff]  ;;  %v150_v23 = vld [vmem:[%s2151_s0 + $0x8] sm:$0xff] }
  0x14   :  { %88 = vadd.xlane.f32.xlu0 %v87_v2  ;;  %91 = vadd.xlane.f32.xlu1 %v90_v3  ;;  %v94_v6 = vmul.f32 32.0, %v1479_v5  ;;  %vm98_vm1 = vweird.f32 %v1479_v5  ;;  %v149_v24 = vld [vmem:[%s2151_s0] sm:$0xff] }
  0x15   :  { %175 = vmatpush.msra.mxu0 %v152_v21  ;;  %v1458_v42 = vld [vmem:[%s2152_s26] ss:$0 sm:$0xff] }
  0x16   :  { %v95_v7 = vsub.f32 1.0, %v94_v6  ;;  %v1459_v46 = vld [vmem:[%s2153_s4] ss:$0 sm:$0xff] }
  0x17   :  { %176 = vmatpush.msra.mxu0 %v151_v22  ;;  %v148_v60 = vld [vmem:[%s2154_s24] sm:$0x3] }
  0x18   :  { %v96_v8 = vmul.f32 %v1479_v5, %v95_v7  ;;  %v1768_v61 = vperm.slane %v148_v60, 0 }
  0x19   :  { %177 = vmatpush.msra.mxu0 %v150_v23 }
  0x1a   :  { %v97_v9 = vadd.f32 %v1479_v5, %v96_v8 }
  0x1b   :  { %178 = vmatpush.msra.mxu0 %v149_v24 }
  0x1c   :  { %v1721_v10 = vsel %vm98_vm1, %v1479_v5, %v97_v9 }
  0x87   :  { %v89_v11 = vpop.xlane.xlu0 %88  ;;  %v92_v12 = vpop.xlane.xlu1 %91 }
  0x88   :  { %v100_v13 = vmul.f32 %v1721_v10, %v89_v11  ;;  %v101_v14 = vmul.f32 %v1721_v10, %v92_v12 }
  0x8a   :  { %v102_v15 = vsub.f32 %v82_v0, %v100_v13  ;;  %v103_v16 = vsub.f32 %v83_v1, %v101_v14 }
  0x8c   :  { %v104_v17 = vmul.f32 %v102_v15, %v102_v15  ;;  %v105_v18 = vmul.f32 %v103_v16, %v103_v16 }
  0x8e   :  { %v106_v19 = vsel %vm86_vm0, %v104_v17, 0.0  ;;  %v109_v20 = vsel %vm86_vm0, %v105_v18, 0.0 }
  0x8f   :  { %107 = vadd.xlane.f32.xlu0 %v106_v19  ;;  %110 = vadd.xlane.f32.xlu1 %v109_v20 }
 0x102   :  { %v108_v25 = vpop.xlane.xlu0 %107  ;;  %v111_v26 = vpop.xlane.xlu1 %110 }
 0x103   :  { %v112_v27 = vmul.f32 %v108_v25, %v1721_v10  ;;  %v113_v28 = vmul.f32 %v111_v26, %v1721_v10  ;;  %v1791_v25 = vperm.slane %v148_v60, 1 }
 0x105   :  { %v114_v29 = vadd.f32 1e-12, %v112_v27  ;;  %v115_v30 = vadd.f32 1e-12, %v113_v28 }
 0x107   :  { %1480 = vrsqrt.f32 %v114_v29  ;;  %vm132_vm2 = vweird.f32 %v115_v30  ;;  %vm122_vm5 = vweird.f32 %v114_v29 }
 0x108   :  { %1482 = vrsqrt.f32 %v115_v30 }
 0x10d   :  { %v1481_v31 = vpop.eup %1480 }
 0x10e   :  { %v1483_v32 = vpop.eup %1482  ;;  %v117_v33 = vmul.f32 %v1481_v31, %v114_v29  ;;  %vm123_vm4 = vweird.f32 %v1481_v31 }
 0x10f   :  { %v127_v34 = vmul.f32 %v1483_v32, %v115_v30  ;;  %vm133_vm3 = vweird.f32 %v1483_v32  ;;  %vm124_vm7 = vmor %vm122_vm5, %vm123_vm4 }
 0x110   :  { %v118_v35 = vmul.f32 %v1481_v31, %v117_v33  ;;  %vm134_vm6 = vmor %vm132_vm2, %vm133_vm3 }
 0x111   :  { %v128_v36 = vmul.f32 %v1483_v32, %v127_v34 }
 0x112   :  { %v119_v37 = vmul.f32 0.5, %v118_v35 }
 0x113   :  { %v129_v38 = vmul.f32 0.5, %v128_v36 }
 0x114   :  { %v120_v39 = vsub.f32 1.5, %v119_v37 }
 0x115   :  { %v130_v40 = vsub.f32 1.5, %v129_v38 }
 0x116   :  { %v121_v41 = vmul.f32 %v1481_v31, %v120_v39 }
 0x117   :  { %v131_v43 = vmul.f32 %v1483_v32, %v130_v40 }
 0x118   :  { %v125_v44 = vsel %vm124_vm7, %v1481_v31, %v121_v41 }
 0x119   :  { %v136_v45 = vmul.f32 %v125_v44, %v102_v15  ;;  %v135_v47 = vsel %vm134_vm6, %v1483_v32, %v131_v43 }
 0x11a   :  { %v137_v49 = vmul.f32 %v135_v47, %v103_v16  ;;  %v468_v47 = vld [vmem:[%s2126_s6 + $0x10] sm:$0xff] }
 0x11b   :  { %v141_v48 = vmul.f32 %v1458_v42, %v136_v45 }
 0x11c   :  { %v142_v51 = vmul.f32 %v1458_v42, %v137_v49  ;;  %v466_v49 = vld [vmem:[%s2126_s6] sm:$0xff] }
 0x11d   :  { %v1747_v50 = vadd.f32 %v1459_v46, %v141_v48  ;;  %v467_v48 = vld [vmem:[%s2126_s6 + $0x8] sm:$0xff] }
 0x11e   :  { %v1751_v52 = vadd.f32 %v1459_v46, %v142_v51  ;;  %v469_v46 = vld [vmem:[%s2126_s6 + $0x18] sm:$0xff] }
 0x11f   :  { %1377 = vmatmul.msk.f32.vlgmr.msra.gmra.mxu0 %vm86_vm0, %v1747_v50 }
 0x127   :  { %1378 = vmatmul.msk.f32.gmra.mxu0 %vm86_vm0, %v1751_v52 }
 0x19c   :  { %v180_v54 = vpop.f32.mrf.mxu0 }
 0x19d   :  { %v181_v55 = vadd.f32 %v1460_v53, %v180_v54 }
 0x19f   :  { %255 = vrot.lane.b32.xlu0 %v181_v55, %s1598_s30  ;;  %187 = vrot.lane.b32.xlu2 %v181_v55, %s1599_s21 }
 0x1a4   :  { %v183_v59 = vpop.f32.mrf.mxu0 }
 0x1a5   :  { %v1772_v4 = vadd.f32 %v1460_v53, %v183_v59 }
 0x1a7   :  { %257 = vrot.lane.b32.xlu2 %v181_v55, %s1600_s1 }
 0x1f9   :  { %v188_v56 = vpop.permute.xlu2 %187 }
 0x1fa   :  { %1379 = vmatpush.xpose.msk.msrb.mxu0 %vm189_vm8, %v188_v56 }
 0x1fd   :  { %1380 = vmatmul.msk.f32.vlgmr.msrb.gmra.mxu0 %vm189_vm8, %v181_v55 }
 0x201   :  { %v258_v57 = vpop.permute.xlu2 %257 }
 0x202   :  { %1382 = vmatpush.xpose.msk.msra.mxu3 %vm189_vm8, %v258_v57 }
 0x211   :  { %v256_v58 = vpop.permute.xlu0 %255 }
 0x212   :  { %1383 = vmatmul.msk.f32.vlgmr.msra.gmra.mxu3 %vm189_vm8, %v256_v58 }
 0x27a   :  { %v211_v62 = vpop.f32.mrf.mxu0 }
 0x27b   :  { %v214_v63 = vmul.f32 0.25, %v211_v62 }
 0x27d   :  { %v216_v0 = vadd.f32 %v1768_v61, %v214_v63 }
 0x27f   :  { %v218_v1 = vsel %vm217_vm9, %v216_v0, -inf }
 0x280   :  { %219 = vmax.xlane.f32.xlu1 %v218_v1  ;;  %v1824_v1 = vld [vmem:[%s2127_s7] ss:$0 sm:$0xff] }
 0x295   :  { %v280_v2 = vpop.f32.mrf.mxu3 }
 0x296   :  { %v283_v3 = vmul.f32 0.25, %v280_v2 }
 0x298   :  { %v284_v5 = vadd.f32 %v283_v3, %v1768_v61 }
 0x299   :  { %328 = vrot.lane.b32.xlu1 %v1772_v4, %s1599_s21 }
 0x29a   :  { %v285_v6 = vsel %vm217_vm9, %v284_v5, -inf }
 0x29b   :  { %286 = vmax.xlane.f32.xlu2 %v285_v6 }
 0x2b3   :  { %229 = vrot.lane.b32.xlu2 %v181_v55, %s1601_s2 }
 0x2bb   :  { %396 = vrot.lane.b32.xlu2 %v1772_v4, %s1600_s1 }
 0x2c3   :  { %394 = vrot.lane.b32.xlu2 %v1772_v4, %s1598_s30 }
 0x2f3   :  { %v220_v7 = vpop.xlane.xlu1 %219 }
 0x2f4   :  { %v221_v8 = vsub.f32 %v216_v0, %v220_v7 }
 0x2f6   :  { %v222_v9 = vmul.f32 1.442695, %v221_v8 }
 0x2f8   :  { %1484 = vpow2.f32 %v222_v9 }
 0x2fe   :  { %v1485_v11 = vpop.eup %1484 }
 0x2ff   :  { %v224_v12 = vsel %vm217_vm9, %v1485_v11, 0.0 }
 0x300   :  { %225 = vadd.xlane.f32.xlu0 %v224_v12 }
 0x30b   :  { %v329_v13 = vpop.permute.xlu1 %328 }
 0x30c   :  { %1385 = vmatpush.xpose.msk.msra.mxu1 %vm189_vm8, %v329_v13 }
 0x30e   :  { %v287_v14 = vpop.xlane.xlu2 %286 }
 0x30f   :  { %v288_v15 = vsub.f32 %v284_v5, %v287_v14  ;;  %1386 = vmatmul.msk.f32.vlgmr.msra.gmra.mxu1 %vm189_vm8, %v1772_v4 }
 0x311   :  { %v289_v16 = vmul.f32 1.442695, %v288_v15 }
 0x313   :  { %1486 = vpow2.f32 %v289_v16  ;;  %v563_v16 = vld [vmem:[%s2130_s10 + $0x10] sm:$0xff] }
 0x314   :  { %296 = vrot.lane.b32.xlu0 %v181_v55, %s1602_s25 }
 0x316   :  { %v230_v17 = vpop.permute.xlu2 %229 }
 0x317   :  { %250 = vmatpush.msra.mxu2 %v230_v17  ;;  %v562_v17 = vld [vmem:[%s2130_s10 + $0x8] sm:$0xff] }
 0x319   :  { %v1487_v18 = vpop.eup %1486 }
 0x31a   :  { %v291_v19 = vsel %vm217_vm9, %v1487_v18, 0.0 }
 0x31b   :  { %292 = vadd.xlane.f32.xlu1 %v291_v19 }
 0x31e   :  { %v397_v24 = vpop.permute.xlu2 %396 }
 0x326   :  { %v395_v33 = vpop.permute.xlu2 %394 }
 0x373   :  { %v226_v20 = vpop.xlane.xlu0 %225 }
 0x374   :  { %1488 = vrcp.f32 %v226_v20 }
 0x37a   :  { %v1489_v21 = vpop.eup %1488 }
 0x37b   :  { %v228_v22 = vmul.f32 %v1489_v21, %v1485_v11 }
 0x37d   :  { %1381 = vmatmul.msk.f32.vlgmr.msra.gmra.mxu2 %vm217_vm9, %v228_v22 }
 0x386   :  { %v297_v23 = vpop.permute.xlu0 %296 }
 0x387   :  { %317 = vmatpush.msrb.mxu2 %v297_v23 }
 0x389   :  { %1388 = vmatpush.xpose.msk.msra.mxu2 %vm189_vm8, %v397_v24 }
 0x38c   :  { %v351_v26 = vpop.f32.mrf.mxu1 }
 0x38d   :  { %v354_v27 = vmul.f32 0.25, %v351_v26 }
 0x38e   :  { %v293_v28 = vpop.xlane.xlu1 %292 }
 0x38f   :  { %1490 = vrcp.f32 %v293_v28  ;;  %v356_v29 = vadd.f32 %v1791_v25, %v354_v27 }
 0x391   :  { %v357_v30 = vsel %vm217_vm9, %v356_v29, -inf }
 0x392   :  { %358 = vmax.xlane.f32.xlu1 %v357_v30 }
 0x395   :  { %v1491_v31 = vpop.eup %1490 }
 0x396   :  { %v295_v32 = vmul.f32 %v1491_v31, %v1487_v18  ;;  %v561_v18 = vld [vmem:[%s2130_s10] sm:$0xff] }
 0x397   :  { %v1851_v31 = vld [vmem:[%s2128_s8] ss:$0 sm:$0xff] }
 0x398   :  { %1384 = vmatmul.msk.f32.vlgmr.msrb.gmra.mxu2 %vm217_vm9, %v295_v32 }
 0x3a0   :  { %1389 = vmatmul.msk.f32.vlgmr.msra.gmra.mxu2 %vm189_vm8, %v395_v33 }
 0x3ab   :  { %368 = vrot.lane.b32.xlu1 %v1772_v4, %s1601_s2 }
 0x400   :  { %v252_v39 = vpop.f32.mrf.mxu2 }
 0x405   :  { %v359_v34 = vpop.xlane.xlu1 %358 }
 0x406   :  { %v360_v35 = vsub.f32 %v356_v29, %v359_v34  ;;  %v1856_v34 = vld [vmem:[%s2129_s9] ss:$0 sm:$0xff] }
 0x408   :  { %v361_v36 = vmul.f32 1.442695, %v360_v35 }
 0x40a   :  { %1492 = vpow2.f32 %v361_v36 }
 0x410   :  { %v1493_v37 = vpop.eup %1492 }
 0x411   :  { %v363_v38 = vsel %vm217_vm9, %v1493_v37, 0.0 }
 0x412   :  { %364 = vadd.xlane.f32.xlu0 %v363_v38  ;;  %v622_v38 = vld [vmem:[%s2132_s12 + $0x30] sm:$0xff] }
 0x41b   :  { %v319_v40 = vpop.f32.mrf.mxu2 }
 0x41c   :  { %323 = vrot.lane.b32.xlu1 %v319_v40, %s2143_s3  ;;  %v620_v40 = vld [vmem:[%s2132_s12 + $0x20] sm:$0xff] }
 0x41d   :  { %v369_v41 = vpop.permute.xlu1 %368 }
 0x41e   :  { %389 = vmatpush.msrb.mxu3 %v369_v41  ;;  %v619_v41 = vld [vmem:[%s2132_s12 + $0x18] sm:$0xff] }
 0x420   :  { %492 = vmatpush.msra.mxu3 %v469_v46  ;;  %v616_v46 = vld [vmem:[%s2132_s12] sm:$0xff] }
 0x422   :  { %493 = vmatpush.msra.mxu3 %v468_v47 }
 0x423   :  { %v419_v42 = vpop.f32.mrf.mxu2 }
 0x424   :  { %v422_v43 = vmul.f32 0.25, %v419_v42  ;;  %494 = vmatpush.msra.mxu3 %v467_v48  ;;  %v618_v42 = vld [vmem:[%s2132_s12 + $0x10] sm:$0xff] }
 0x426   :  { %v423_v44 = vadd.f32 %v422_v43, %v1791_v25  ;;  %495 = vmatpush.msra.mxu3 %v466_v49  ;;  %v617_v43 = vld [vmem:[%s2132_s12 + $0x8] sm:$0xff]  ;;  %v1464_v49 = vld [vmem:[%s2131_s11] ss:$0 sm:$0xff] }
 0x428   :  { %v424_v45 = vsel %vm217_vm9, %v423_v44, -inf }
 0x429   :  { %425 = vmax.xlane.f32.xlu2 %v424_v45 }
 0x441   :  { %435 = vrot.lane.b32.xlu2 %v1772_v4, %s1602_s25 }
 0x485   :  { %v365_v51 = vpop.xlane.xlu0 %364 }
 0x486   :  { %1494 = vrcp.f32 %v365_v51 }
 0x48c   :  { %v1495_v53 = vpop.eup %1494 }
 0x48d   :  { %v367_v54 = vmul.f32 %v1495_v53, %v1493_v37  ;;  %v623_v37 = vld [vmem:[%s2132_s12 + $0x38] sm:$0xff] }
 0x48e   :  { %v324_v55 = vpop.permute.xlu1 %323  ;;  %643 = vmatpush.msrb.mxu2 %v623_v37 }
 0x48f   :  { %1387 = vmatmul.msk.f32.vlgmr.msrb.gmra.mxu3 %vm217_vm9, %v367_v54  ;;  %v326_v56 = vsel %vm189_vm8, %v252_v39, %v324_v55  ;;  %v621_v39 = vld [vmem:[%s2132_s12 + $0x28] sm:$0xff] }
 0x490   :  { %644 = vmatpush.msrb.mxu2 %v622_v38 }
 0x492   :  { %645 = vmatpush.msrb.mxu2 %v621_v39 }
 0x494   :  { %646 = vmatpush.msrb.mxu2 %v620_v40 }
 0x496   :  { %647 = vmatpush.msrb.mxu2 %v619_v41 }
 0x497   :  { %1391 = vmatmul.msk.f32.vlgmr.msra.gmra.mxu3 %vm86_vm0, %v326_v56 }
 0x498   :  { %648 = vmatpush.msrb.mxu2 %v618_v42 }
 0x49a   :  { %649 = vmatpush.msrb.mxu2 %v617_v43 }
 0x49c   :  { %v426_v57 = vpop.xlane.xlu2 %425  ;;  %650 = vmatpush.msrb.mxu2 %v616_v46 }
 0x49d   :  { %v427_v58 = vsub.f32 %v423_v44, %v426_v57 }
 0x49f   :  { %v428_v59 = vmul.f32 1.442695, %v427_v58 }
 0x4a1   :  { %1496 = vpow2.f32 %v428_v59 }
 0x4a4   :  { %v436_v60 = vpop.permute.xlu2 %435 }
 0x4a5   :  { %456 = vmatpush.msrb.mxu1 %v436_v60 }
 0x4a7   :  { %v1497_v62 = vpop.eup %1496 }
 0x4a8   :  { %v430_v63 = vsel %vm217_vm9, %v1497_v62, 0.0 }
 0x4a9   :  { %431 = vadd.xlane.f32.xlu1 %v430_v63 }
 0x512   :  { %v391_v0 = vpop.f32.mrf.mxu3 }
 0x51a   :  { %v497_v2 = vpop.f32.mrf.mxu3 }
 0x51b   :  { %v498_v3 = vadd.f32 %v1824_v1, %v497_v2 }
 0x51c   :  { %v432_v4 = vpop.xlane.xlu1 %431 }
 0x51d   :  { %1498 = vrcp.f32 %v432_v4  ;;  %v503_v5 = vadd.f32 %v498_v3, %v1747_v50  ;;  %v564_v50 = vld [vmem:[%s2130_s10 + $0x18] sm:$0xff]  ;;  %v1897_v4 = vld [vmem:[%s2133_s13] ss:$0 sm:$0xff] }
 0x51e   :  { %587 = vmatpush.msra.mxu0 %v564_v50 }
 0x51f   :  { %v507_v6 = vsel %vm86_vm0, %v503_v5, 0.0 }
 0x520   :  { %508 = vadd.xlane.f32.xlu0 %v507_v6  ;;  %588 = vmatpush.msra.mxu0 %v563_v16 }
 0x522   :  { %589 = vmatpush.msra.mxu0 %v562_v17 }
 0x523   :  { %v1499_v7 = vpop.eup %1498 }
 0x524   :  { %v434_v8 = vmul.f32 %v1499_v7, %v1497_v62  ;;  %590 = vmatpush.msra.mxu0 %v561_v18 }
 0x526   :  { %1390 = vmatmul.msk.f32.vlgmr.msrb.gmra.mxu1 %vm217_vm9, %v434_v8 }
 0x593   :  { %v509_v9 = vpop.xlane.xlu0 %508 }
 0x594   :  { %v513_v11 = vmul.f32 %v509_v9, %v1721_v10 }
 0x596   :  { %v515_v12 = vsub.f32 %v503_v5, %v513_v11 }
 0x598   :  { %v517_v13 = vmul.f32 %v515_v12, %v515_v12 }
 0x59a   :  { %v519_v14 = vsel %vm86_vm0, %v517_v13, 0.0 }
 0x59b   :  { %520 = vadd.xlane.f32.xlu2 %v519_v14 }
 0x5a3   :  { %v458_v15 = vpop.f32.mrf.mxu1 }
 0x5a4   :  { %462 = vrot.lane.b32.xlu0 %v458_v15, %s2143_s3  ;;  %s1604_s3 = smov [#allocation5]  }
 0x5a5   :  { %s1365_s27 = sshll.u32 %s1604_s3, 4  ;;  %s1366_s27 = int_to_ptr.vmem [resolvable:$true] %s1365_s27 }
 0x60e   :  { %v521_v19 = vpop.xlane.xlu2 %520 }
 0x60f   :  { %v525_v20 = vmul.f32 %v521_v19, %v1721_v10 }
 0x611   :  { %v527_v21 = vadd.f32 1e-12, %v525_v20 }
 0x613   :  { %1500 = vrsqrt.f32 %v527_v21  ;;  %vm535_vm11 = vweird.f32 %v527_v21 }
 0x616   :  { %v463_v22 = vpop.permute.xlu0 %462 }
 0x617   :  { %v465_v23 = vsel %vm189_vm8, %v391_v0, %v463_v22 }
 0x618   :  { %1392 = vmatmul.msk.f32.gmra.mxu3 %vm86_vm0, %v465_v23 }
 0x619   :  { %v1501_v24 = vpop.eup %1500 }
 0x61a   :  { %v530_v26 = vmul.f32 %v1501_v24, %v527_v21  ;;  %vm536_vm10 = vweird.f32 %v1501_v24 }
 0x61b   :  { %vm537_vm12 = vmor %vm535_vm11, %vm536_vm10 }
 0x61c   :  { %v531_v27 = vmul.f32 %v1501_v24, %v530_v26 }
 0x61e   :  { %v532_v28 = vmul.f32 0.5, %v531_v27 }
 0x620   :  { %v533_v29 = vsub.f32 1.5, %v532_v28 }
 0x622   :  { %v534_v30 = vmul.f32 %v1501_v24, %v533_v29 }
 0x624   :  { %v538_v32 = vsel %vm537_vm12, %v1501_v24, %v534_v30 }
 0x625   :  { %v549_v33 = vmul.f32 %v538_v32, %v515_v12  ;;  %v1400_v32 = vld [vmem:[%s2151_s0 + $0x38] sm:$0xff] }
 0x626   :  { %744 = vmatpush.msra.mxu1 %v1400_v32 }
 0x627   :  { %v554_v35 = vmul.f32 %v1851_v31, %v549_v33  ;;  %v1399_v33 = vld [vmem:[%s2151_s0 + $0x30] sm:$0xff] }
 0x628   :  { %745 = vmatpush.msra.mxu1 %v1399_v33 }
 0x629   :  { %v559_v36 = vadd.f32 %v1856_v34, %v554_v35  ;;  %v1398_v35 = vld [vmem:[%s2151_s0 + $0x28] sm:$0xff] }
 0x62a   :  { %746 = vmatpush.msra.mxu1 %v1398_v35 }
 0x62b   :  { %1393 = vmatmul.msk.f32.vlgmr.msra.gmra.mxu0 %vm86_vm0, %v559_v36 }
 0x69b   :  { %v500_v44 = vpop.f32.mrf.mxu3 }
 0x69c   :  { %v501_v45 = vadd.f32 %v1824_v1, %v500_v44 }
 0x69e   :  { %v504_v47 = vadd.f32 %v501_v45, %v1751_v52 }
 0x6a0   :  { %v510_v48 = vsel %vm86_vm0, %v504_v47, 0.0 }
 0x6a1   :  { %511 = vadd.xlane.f32.xlu0 %v510_v48 }
 0x6a8   :  { %v592_v51 = vpop.f32.mrf.mxu0 }
 0x6a9   :  { %v593_v53 = vadd.f32 %v1464_v49, %v592_v51 }
 0x6ab   :  { %v600_v54 = vmul.f32 0.044715, %v593_v53  ;;  %v598_v60 = vmul.f32 0.5, %v593_v53 }
 0x6ad   :  { %v602_v55 = vmul.f32 %v600_v54, %v593_v53  ;;  %v1466_v54 = vld [vmem:[%s2134_s14] ss:$0 sm:$0xff] }
 0x6af   :  { %v604_v56 = vmul.f32 %v602_v55, %v593_v53 }
 0x6b1   :  { %v606_v57 = vadd.f32 %v604_v56, %v593_v53 }
 0x6b3   :  { %v608_v58 = vmul.f32 0.7978846, %v606_v57  ;;  %v1467_v57 = vld [vmem:[%s2135_s15] ss:$0 sm:$0xff] }
 0x6b5   :  { %1502 = vtanh.f32 %v608_v58 }
 0x6bb   :  { %v1503_v59 = vpop.eup %1502 }
 0x6bc   :  { %v612_v62 = vadd.f32 1.0, %v1503_v59 }
 0x6be   :  { %v614_v52 = vmul.f32 %v612_v62, %v598_v60 }
 0x6c0   :  { %1395 = vmatmul.msk.f32.vlgmr.msrb.gmra.mxu2 %vm628_vm13, %v614_v52 }
 0x714   :  { %v512_v63 = vpop.xlane.xlu0 %511 }
 0x715   :  { %v514_v0 = vmul.f32 %v512_v63, %v1721_v10 }
 0x717   :  { %v516_v1 = vsub.f32 %v504_v47, %v514_v0  ;;  %v1468_v0 = vld [vmem:[%s2125_s5 + $0x1] ss:$0 sm:$0xff] }
 0x719   :  { %v518_v2 = vmul.f32 %v516_v1, %v516_v1 }
 0x71b   :  { %v522_v3 = vsel %vm86_vm0, %v518_v2, 0.0 }
 0x71c   :  { %523 = vadd.xlane.f32.xlu1 %v522_v3 }
 0x743   :  { %v652_v5 = vpop.f32.mrf.mxu2 }
 0x744   :  { %v653_v6 = vadd.f32 %v1897_v4, %v652_v5 }
 0x746   :  { %v658_v7 = vadd.f32 %v653_v6, %v559_v36  ;;  %v1397_v36 = vld [vmem:[%s2151_s0 + $0x20] sm:$0xff]  ;;  %s1367_s0 = sshll.u32 %s2140_s20, 4  ;;  %s1368_s0 = int_to_ptr.hbm [resolvable:$true] %s1367_s0 }
 0x747   :  { %747 = vmatpush.msra.mxu1 %v1397_v36 }
 0x748   :  { %v662_v8 = vsel %vm86_vm0, %v658_v7, 0.0 }
 0x749   :  { %663 = vadd.xlane.f32.xlu1 %v662_v8 }
 0x78f   :  { %v524_v9 = vpop.xlane.xlu1 %523 }
 0x790   :  { %v526_v11 = vmul.f32 %v524_v9, %v1721_v10 }
 0x792   :  { %v528_v12 = vadd.f32 1e-12, %v526_v11 }
 0x794   :  { %1504 = vrsqrt.f32 %v528_v12  ;;  %vm545_vm15 = vweird.f32 %v528_v12 }
 0x79a   :  { %v1505_v13 = vpop.eup %1504 }
 0x79b   :  { %v540_v14 = vmul.f32 %v1505_v13, %v528_v12  ;;  %vm546_vm14 = vweird.f32 %v1505_v13 }
 0x79c   :  { %vm547_vm1 = vmor %vm545_vm15, %vm546_vm14 }
 0x79d   :  { %v541_v15 = vmul.f32 %v1505_v13, %v540_v14 }
 0x79f   :  { %v542_v50 = vmul.f32 0.5, %v541_v15 }
 0x7a1   :  { %v543_v16 = vsub.f32 1.5, %v542_v50 }
 0x7a3   :  { %v544_v17 = vmul.f32 %v1505_v13, %v543_v16 }
 0x7a5   :  { %v548_v18 = vsel %vm547_vm1, %v1505_v13, %v544_v17 }
 0x7a6   :  { %v550_v19 = vmul.f32 %v548_v18, %v516_v1 }
 0x7a8   :  { %v555_v20 = vmul.f32 %v1851_v31, %v550_v19 }
 0x7aa   :  { %v560_v21 = vadd.f32 %v1856_v34, %v555_v20 }
 0x7ac   :  { %1394 = vmatmul.msk.f32.gmra.mxu0 %vm86_vm0, %v560_v21 }
 0x7bc   :  { %v664_v22 = vpop.xlane.xlu1 %663 }
 0x7bd   :  { %v668_v23 = vmul.f32 %v664_v22, %v1721_v10 }
 0x7bf   :  { %v670_v24 = vsub.f32 %v658_v7, %v668_v23 }
 0x7c1   :  { %v672_v26 = vmul.f32 %v670_v24, %v670_v24 }
 0x7c3   :  { %v674_v27 = vsel %vm86_vm0, %v672_v26, 0.0 }
 0x7c4   :  { %675 = vadd.xlane.f32.xlu1 %v674_v27 }
 0x829   :  { %v595_v28 = vpop.f32.mrf.mxu0 }
 0x82a   :  { %v596_v29 = vadd.f32 %v1464_v49, %v595_v28 }
 0x82c   :  { %v601_v30 = vmul.f32 0.044715, %v596_v29  ;;  %v599_v43 = vmul.f32 0.5, %v596_v29 }
 0x82e   :  { %v603_v31 = vmul.f32 %v601_v30, %v596_v29 }
 0x830   :  { %v605_v34 = vmul.f32 %v603_v31, %v596_v29 }
 0x832   :  { %v607_v37 = vadd.f32 %v605_v34, %v596_v29 }
 0x834   :  { %v609_v38 = vmul.f32 0.7978846, %v607_v37 }
 0x836   :  { %1506 = vtanh.f32 %v609_v38 }
 0x837   :  { %v676_v39 = vpop.xlane.xlu1 %675 }
 0x838   :  { %v680_v40 = vmul.f32 %v676_v39, %v1721_v10 }
 0x83a   :  { %v682_v41 = vadd.f32 1e-12, %v680_v40 }
 0x83c   :  { %v1507_v42 = vpop.eup %1506  ;;  %1508 = vrsqrt.f32 %v682_v41  ;;  %vm690_vm3 = vweird.f32 %v682_v41 }
 0x83d   :  { %v613_v44 = vadd.f32 1.0, %v1507_v42 }
 0x83f   :  { %v615_v45 = vmul.f32 %v613_v44, %v599_v43 }
 0x841   :  { %1396 = vmatmul.msk.f32.gmra.mxu2 %vm628_vm13, %v615_v45 }
 0x842   :  { %v1509_v46 = vpop.eup %1508 }
 0x843   :  { %v685_v47 = vmul.f32 %v1509_v46, %v682_v41  ;;  %vm691_vm2 = vweird.f32 %v1509_v46 }
 0x844   :  { %vm692_vm4 = vmor %vm690_vm3, %vm691_vm2 }
 0x845   :  { %v686_v48 = vmul.f32 %v1509_v46, %v685_v47 }
 0x847   :  { %v687_v49 = vmul.f32 0.5, %v686_v48 }
 0x849   :  { %v688_v51 = vsub.f32 1.5, %v687_v49 }
 0x84b   :  { %v689_v53 = vmul.f32 %v1509_v46, %v688_v51 }
 0x84d   :  { %v693_v55 = vsel %vm692_vm4, %v1509_v46, %v689_v53 }
 0x84e   :  { %v704_v56 = vmul.f32 %v693_v55, %v670_v24 }
 0x850   :  { %v709_v58 = vmul.f32 %v1466_v54, %v704_v56 }
 0x852   :  { %v1927_v59 = vadd.f32 %v1467_v57, %v709_v58 }
 0x854   :  { %1402 = vmatmul.msk.f32.vlgmr.msra.gmra.mxu1 %vm86_vm0, %v1927_v59 }
 0x8c4   :  { %v655_v60 = vpop.f32.mrf.mxu2 }
 0x8c5   :  { %v656_v62 = vadd.f32 %v1897_v4, %v655_v60 }
 0x8c7   :  { %v659_v52 = vadd.f32 %v656_v62, %v560_v21 }
 0x8c9   :  { %v665_v63 = vsel %vm86_vm0, %v659_v52, 0.0 }
 0x8ca   :  { %666 = vadd.xlane.f32.xlu1 %v665_v63 }
 0x8d1   :  { %v749_v1 = vpop.f32.mrf.mxu1 }
 0x8d2   :  { %v1936_v2 = vadd.f32 %v1468_v0, %v749_v1 }
 0x8d4   :  { %756 = vrot.lane.b32.xlu2 %v1936_v2, %s1599_s21 }
 0x92e   :  { %v757_v3 = vpop.permute.xlu2 %756 }
 0x92f   :  { %1404 = vmatpush.xpose.msk.msrb.mxu3 %vm189_vm8, %v757_v3 }
 0x932   :  { %1405 = vmatmul.msk.f32.vlgmr.msrb.gmra.mxu3 %vm189_vm8, %v1936_v2 }
 0x93d   :  { %v667_v4 = vpop.xlane.xlu1 %666 }
 0x93e   :  { %v669_v5 = vmul.f32 %v667_v4, %v1721_v10 }
 0x940   :  { %v671_v6 = vsub.f32 %v659_v52, %v669_v5 }
 0x942   :  { %v673_v7 = vmul.f32 %v671_v6, %v671_v6 }
 0x944   :  { %v677_v8 = vsel %vm86_vm0, %v673_v7, 0.0 }
 0x945   :  { %678 = vadd.xlane.f32.xlu1 %v677_v8 }
 0x95e   :  { %823 = vrot.lane.b32.xlu1 %v1936_v2, %s1600_s1 }
 0x966   :  { %795 = vrot.lane.b32.xlu1 %v1936_v2, %s1601_s2 }
 0x9b5   :  { %v779_v9 = vpop.f32.mrf.mxu3 }
 0x9b6   :  { %v782_v11 = vmul.f32 0.25, %v779_v9 }
 0x9b8   :  { %v679_v12 = vpop.xlane.xlu1 %678  ;;  %v783_v13 = vadd.f32 %v782_v11, %v1768_v61 }
 0x9b9   :  { %v681_v14 = vmul.f32 %v679_v12, %v1721_v10 }
 0x9ba   :  { %v784_v15 = vsel %vm217_vm9, %v783_v13, -inf }
 0x9bb   :  { %v683_v50 = vadd.f32 1e-12, %v681_v14  ;;  %785 = vmax.xlane.f32.xlu0 %v784_v15 }
 0x9bd   :  { %1510 = vrsqrt.f32 %v683_v50  ;;  %vm700_vm6 = vweird.f32 %v683_v50 }
 0x9c3   :  { %v1511_v16 = vpop.eup %1510 }
 0x9c4   :  { %v695_v17 = vmul.f32 %v1511_v16, %v683_v50  ;;  %vm701_vm5 = vweird.f32 %v1511_v16 }
 0x9c5   :  { %vm702_vm7 = vmor %vm700_vm6, %vm701_vm5  ;;  %vm1293_vm5 = vcmask 1040384   ;;  %vm1358_vm6 = vcmask 17408  }
 0x9c6   :  { %v696_v18 = vmul.f32 %v1511_v16, %v695_v17  ;;  %v1418_v17 = vld [vmem:[%s2126_s6 + $0x30] sm:$0xff] }
 0x9c8   :  { %v697_v19 = vmul.f32 0.5, %v696_v18  ;;  %v1417_v18 = vld [vmem:[%s2126_s6 + $0x28] sm:$0xff] }
 0x9ca   :  { %v698_v20 = vsub.f32 1.5, %v697_v19 }
 0x9cc   :  { %v699_v21 = vmul.f32 %v1511_v16, %v698_v20 }
 0x9ce   :  { %v703_v22 = vsel %vm702_vm7, %v1511_v16, %v699_v21  ;;  %v1419_v16 = vld [vmem:[%s2126_s6 + $0x38] sm:$0xff] }
 0x9cf   :  { %821 = vrot.lane.b32.xlu0 %v1936_v2, %s1598_s30  ;;  %v705_v23 = vmul.f32 %v703_v22, %v671_v6 }
 0x9d0   :  { %v824_v24 = vpop.permute.xlu1 %823 }
 0x9d1   :  { %1407 = vmatpush.xpose.msk.msrb.mxu1 %vm189_vm8, %v824_v24  ;;  %v710_v26 = vmul.f32 %v1466_v54, %v705_v23  ;;  %v1416_v24 = vld [vmem:[%s2126_s6 + $0x20] sm:$0xff] }
 0x9d3   :  { %v1955_v27 = vadd.f32 %v1467_v57, %v710_v26 }
 0x9d5   :  { %1403 = vmatmul.msk.f32.gmra.mxu1 %vm86_vm0, %v1955_v27 }
 0x9d8   :  { %v796_v28 = vpop.permute.xlu1 %795 }
 0x9d9   :  { %816 = vmatpush.msrb.mxu0 %v796_v28 }
 0xa2e   :  { %v786_v29 = vpop.xlane.xlu0 %785 }
 0xa2f   :  { %v787_v30 = vsub.f32 %v783_v13, %v786_v29 }
 0xa31   :  { %v788_v32 = vmul.f32 1.442695, %v787_v30 }
 0xa33   :  { %1512 = vpow2.f32 %v788_v32 }
 0xa39   :  { %v1513_v31 = vpop.eup %1512 }
 0xa3a   :  { %v790_v33 = vsel %vm217_vm9, %v1513_v31, 0.0 }
 0xa3b   :  { %791 = vadd.xlane.f32.xlu0 %v790_v33  ;;  %v1469_v33 = vld [vmem:[%s2127_s7 + $0x1] ss:$0 sm:$0xff] }
 0xa41   :  { %v822_v34 = vpop.permute.xlu0 %821 }
 0xa42   :  { %1408 = vmatmul.msk.f32.vlgmr.msrb.gmra.mxu1 %vm189_vm8, %v822_v34 }
 0xa52   :  { %v752_v35 = vpop.f32.mrf.mxu1 }
 0xa53   :  { %v1961_v36 = vadd.f32 %v1468_v0, %v752_v35 }
 0xa55   :  { %961 = vrot.lane.b32.xlu2 %v1961_v36, %s1600_s1 }
 0xa5d   :  { %959 = vrot.lane.b32.xlu2 %v1961_v36, %s1598_s30 }
 0xa65   :  { %894 = vrot.lane.b32.xlu2 %v1961_v36, %s1599_s21 }
 0xaae   :  { %v792_v37 = vpop.xlane.xlu0 %791 }
 0xaaf   :  { %1514 = vrcp.f32 %v792_v37  ;;  %v962_v38 = vpop.permute.xlu2 %961 }
 0xab0   :  { %1413 = vmatpush.xpose.msk.msra.mxu1 %vm189_vm8, %v962_v38 }
 0xab5   :  { %v1515_v39 = vpop.eup %1514 }
 0xab6   :  { %v794_v40 = vmul.f32 %v1515_v39, %v1513_v31 }
 0xab7   :  { %v960_v41 = vpop.permute.xlu2 %959 }
 0xab8   :  { %1406 = vmatmul.msk.f32.vlgmr.msrb.gmra.mxu0 %vm217_vm9, %v794_v40  ;;  %1414 = vmatmul.msk.f32.vlgmr.msra.gmra.mxu1 %vm189_vm8, %v960_v41 }
 0xabf   :  { %v895_v42 = vpop.permute.xlu2 %894  ;;  %v846_v43 = vpop.f32.mrf.mxu1 }
 0xac0   :  { %v849_v44 = vmul.f32 0.25, %v846_v43  ;;  %1410 = vmatpush.xpose.msk.msra.mxu0 %vm189_vm8, %v895_v42 }
 0xac2   :  { %v850_v45 = vadd.f32 %v849_v44, %v1768_v61 }
 0xac3   :  { %1411 = vmatmul.msk.f32.vlgmr.msra.gmra.mxu0 %vm189_vm8, %v1961_v36 }
 0xac4   :  { %v851_v46 = vsel %vm217_vm9, %v850_v45, -inf  ;;  %1059 = vmatpush.msrb.mxu0 %v1419_v16 }
 0xac5   :  { %852 = vmax.xlane.f32.xlu1 %v851_v46 }
 0xac6   :  { %1060 = vmatpush.msrb.mxu0 %v1418_v17 }
 0xac8   :  { %1061 = vmatpush.msrb.mxu0 %v1417_v18 }
 0xaca   :  { %1062 = vmatpush.msrb.mxu0 %v1416_v24  ;;  %v1434_v24 = vld [vmem:[%s2132_s12 + $0x50] sm:$0xff] }
 0xb35   :  { %v984_v47 = vpop.f32.mrf.mxu1  ;;  %v1978_v53 = vpop.f32.mrf.mxu0 }
 0xb36   :  { %v987_v48 = vmul.f32 0.25, %v984_v47 }
 0xb38   :  { %v853_v49 = vpop.xlane.xlu1 %852  ;;  %v988_v51 = vadd.f32 %v987_v48, %v1791_v25 }
 0xb39   :  { %v854_v54 = vsub.f32 %v850_v45, %v853_v49 }
 0xb3a   :  { %v989_v55 = vsel %vm217_vm9, %v988_v51, -inf }
 0xb3b   :  { %v855_v56 = vmul.f32 1.442695, %v854_v54  ;;  %990 = vmax.xlane.f32.xlu2 %v989_v55  ;;  %v1426_v54 = vld [vmem:[%s2130_s10 + $0x28] sm:$0xff]  ;;  %v1425_v55 = vld [vmem:[%s2130_s10 + $0x20] sm:$0xff] }
 0xb3d   :  { %1516 = vpow2.f32 %v855_v56 }
 0xb40   :  { %v917_v61 = vpop.f32.mrf.mxu0 }
 0xb41   :  { %v920_v58 = vmul.f32 0.25, %v917_v61 }
 0xb43   :  { %v1517_v57 = vpop.eup %1516  ;;  %v921_v62 = vadd.f32 %v920_v58, %v1791_v25 }
 0xb44   :  { %v857_v60 = vsel %vm217_vm9, %v1517_v57, 0.0 }
 0xb45   :  { %858 = vadd.xlane.f32.xlu0 %v857_v60  ;;  %v922_v52 = vsel %vm217_vm9, %v921_v62, -inf }
 0xb4d   :  { %923 = vmax.xlane.f32.xlu0 %v922_v52 }
 0xb53   :  { %862 = vrot.lane.b32.xlu2 %v1936_v2, %s1602_s25 }
 0xb61   :  { %1000 = vrot.lane.b32.xlu0 %v1961_v36, %s1602_s25 }
 0xbae   :  { %v991_v63 = vpop.xlane.xlu2 %990 }
 0xbaf   :  { %v992_v0 = vsub.f32 %v988_v51, %v991_v63 }
 0xbb1   :  { %v993_v1 = vmul.f32 1.442695, %v992_v0 }
 0xbb3   :  { %1518 = vpow2.f32 %v993_v1  ;;  %v1470_v1 = vld [vmem:[%s2128_s8 + $0x1] ss:$0 sm:$0xff] }
 0xbb6   :  { %v863_v3 = vpop.permute.xlu2 %862 }
 0xbb7   :  { %883 = vmatpush.msra.mxu3 %v863_v3 }
 0xbb8   :  { %v859_v4 = vpop.xlane.xlu0 %858 }
 0xbb9   :  { %v1519_v5 = vpop.eup %1518  ;;  %1520 = vrcp.f32 %v859_v4 }
 0xbba   :  { %v995_v25 = vsel %vm217_vm9, %v1519_v5, 0.0 }
 0xbbb   :  { %996 = vadd.xlane.f32.xlu1 %v995_v25 }
 0xbbf   :  { %v1521_v6 = vpop.eup %1520 }
 0xbc0   :  { %v861_v7 = vmul.f32 %v1521_v6, %v1517_v57  ;;  %v924_v8 = vpop.xlane.xlu0 %923 }
 0xbc1   :  { %v925_v9 = vsub.f32 %v921_v62, %v924_v8 }
 0xbc2   :  { %1409 = vmatmul.msk.f32.vlgmr.msra.gmra.mxu3 %vm217_vm9, %v861_v7 }
 0xbc3   :  { %v926_v2 = vmul.f32 1.442695, %v925_v9 }
 0xbc5   :  { %1522 = vpow2.f32 %v926_v2 }
 0xbcb   :  { %v1523_v11 = vpop.eup %1522 }
 0xbcc   :  { %v928_v12 = vsel %vm217_vm9, %v1523_v11, 0.0 }
 0xbcd   :  { %929 = vadd.xlane.f32.xlu1 %v928_v12 }
 0xbd3   :  { %v1001_v13 = vpop.permute.xlu0 %1000 }
 0xbd4   :  { %1021 = vmatpush.msrb.mxu3 %v1001_v13 }
 0xbe6   :  { %933 = vrot.lane.b32.xlu1 %v1961_v36, %s1601_s2  ;;  %s2155_s2 = smov 16  }
 0xc2e   :  { %v997_v14 = vpop.xlane.xlu1 %996 }
 0xc2f   :  { %1524 = vrcp.f32 %v997_v14 }
 0xc35   :  { %v1525_v15 = vpop.eup %1524 }
 0xc36   :  { %v999_v50 = vmul.f32 %v1525_v15, %v1519_v5  ;;  %v1471_v5 = vld [vmem:[%s2129_s9 + $0x1] ss:$0 sm:$0xff] }
 0xc38   :  { %1415 = vmatmul.msk.f32.vlgmr.msrb.gmra.mxu3 %vm217_vm9, %v999_v50 }
 0xc40   :  { %v930_v20 = vpop.xlane.xlu1 %929 }
 0xc41   :  { %1526 = vrcp.f32 %v930_v20  ;;  %v1438_v20 = vld [vmem:[%s2132_s12 + $0x70] sm:$0xff] }
 0xc45   :  { %v885_v19 = vpop.f32.mrf.mxu3 }
 0xc46   :  { %889 = vrot.lane.b32.xlu0 %v885_v19, %s2155_s2  ;;  %v1439_v19 = vld [vmem:[%s2132_s12 + $0x78] sm:$0xff] }
 0xc47   :  { %v1527_v21 = vpop.eup %1526  ;;  %1215 = vmatpush.msrb.mxu1 %v1439_v19 }
 0xc48   :  { %v932_v22 = vmul.f32 %v1527_v21, %v1523_v11  ;;  %v1437_v21 = vld [vmem:[%s2132_s12 + $0x68] sm:$0xff] }
 0xc49   :  { %1216 = vmatpush.msrb.mxu1 %v1438_v20 }
 0xc4b   :  { %1217 = vmatpush.msrb.mxu1 %v1437_v21 }
 0xc58   :  { %v934_v23 = vpop.permute.xlu1 %933 }
 0xc59   :  { %954 = vmatpush.msra.mxu2 %v934_v23  ;;  %v1435_v23 = vld [vmem:[%s2132_s12 + $0x58] sm:$0xff] }
 0xc5a   :  { %1412 = vmatmul.msk.f32.vlgmr.msra.gmra.mxu2 %vm217_vm9, %v932_v22  ;;  %v1436_v22 = vld [vmem:[%s2132_s12 + $0x60] sm:$0xff] }
 0xc5b   :  { %1218 = vmatpush.msrb.mxu1 %v1436_v22 }
 0xc5d   :  { %1219 = vmatpush.msrb.mxu1 %v1435_v23 }
 0xc5f   :  { %1220 = vmatpush.msrb.mxu1 %v1434_v24 }
 0xcb8   :  { %v890_v26 = vpop.permute.xlu0 %889 }
 0xcb9   :  { %v892_v28 = vsel %vm189_vm8, %v1978_v53, %v890_v26  ;;  %v1427_v53 = vld [vmem:[%s2130_s10 + $0x30] sm:$0xff]  ;;  %v1433_v26 = vld [vmem:[%s2132_s12 + $0x48] sm:$0xff] }
 0xcba   :  { %1421 = vmatmul.msk.f32.vlgmr.msrb.gmra.mxu0 %vm86_vm0, %v892_v28  ;;  %v1432_v28 = vld [vmem:[%s2132_s12 + $0x40] sm:$0xff]  ;;  %1221 = vmatpush.msrb.mxu1 %v1433_v26 }
 0xcbb   :  { %v1023_v29 = vpop.f32.mrf.mxu3 }
 0xcbc   :  { %1027 = vrot.lane.b32.xlu2 %v1023_v29, %s2155_s2  ;;  %1222 = vmatpush.msrb.mxu1 %v1432_v28  ;;  %v1472_v29 = vld [vmem:[%s2131_s11 + $0x1] ss:$0 sm:$0xff] }
 0xcdd   :  { %v956_v30 = vpop.f32.mrf.mxu2 }
 0xd16   :  { %v1028_v32 = vpop.permute.xlu2 %1027 }
 0xd17   :  { %v1030_v31 = vsel %vm189_vm8, %v956_v30, %v1028_v32 }
 0xd18   :  { %1422 = vmatmul.msk.f32.gmra.mxu0 %vm86_vm0, %v1030_v31 }
 0xd37   :  { %v1064_v34 = vpop.f32.mrf.mxu0 }
 0xd38   :  { %v1065_v35 = vadd.f32 %v1469_v33, %v1064_v34 }
 0xd3a   :  { %v1070_v36 = vadd.f32 %v1065_v35, %v1927_v59 }
 0xd3c   :  { %v1076_v37 = vsel %vm86_vm0, %v1070_v36, 0.0 }
 0xd3d   :  { %1077 = vadd.xlane.f32.xlu0 %v1076_v37 }
 0xd95   :  { %v1067_v38 = vpop.f32.mrf.mxu0 }
 0xd96   :  { %v1068_v39 = vadd.f32 %v1469_v33, %v1067_v38 }
 0xd98   :  { %v1071_v40 = vadd.f32 %v1068_v39, %v1955_v27  ;;  %v1428_v27 = vld [vmem:[%s2130_s10 + $0x38] sm:$0xff] }
 0xd99   :  { %1158 = vmatpush.msrb.mxu2 %v1428_v27  ;;  %v1473_v27 = vld [vmem:[%s2133_s13 + $0x1] ss:$0 sm:$0xff] }
 0xd9a   :  { %v1079_v41 = vsel %vm86_vm0, %v1071_v40, 0.0 }
 0xd9b   :  { %1080 = vadd.xlane.f32.xlu2 %v1079_v41  ;;  %1159 = vmatpush.msrb.mxu2 %v1427_v53 }
 0xd9d   :  { %1160 = vmatpush.msrb.mxu2 %v1426_v54 }
 0xd9f   :  { %1161 = vmatpush.msrb.mxu2 %v1425_v55 }
 0xdb0   :  { %v1078_v42 = vpop.xlane.xlu0 %1077 }
 0xdb1   :  { %v1082_v43 = vmul.f32 %v1078_v42, %v1721_v10 }
 0xdb3   :  { %v1084_v44 = vsub.f32 %v1070_v36, %v1082_v43 }
 0xdb5   :  { %v1086_v45 = vmul.f32 %v1084_v44, %v1084_v44 }
 0xdb7   :  { %v1088_v46 = vsel %vm86_vm0, %v1086_v45, 0.0 }
 0xdb8   :  { %1089 = vadd.xlane.f32.xlu1 %v1088_v46 }
 0xe0e   :  { %v1081_v47 = vpop.xlane.xlu2 %1080 }
 0xe0f   :  { %v1083_v59 = vmul.f32 %v1081_v47, %v1721_v10 }
 0xe11   :  { %v1085_v48 = vsub.f32 %v1071_v40, %v1083_v59 }
 0xe13   :  { %v1087_v49 = vmul.f32 %v1085_v48, %v1085_v48 }
 0xe15   :  { %v1091_v51 = vsel %vm86_vm0, %v1087_v49, 0.0 }
 0xe16   :  { %1092 = vadd.xlane.f32.xlu2 %v1091_v51 }
 0xe2b   :  { %v1090_v56 = vpop.xlane.xlu1 %1089 }
 0xe2c   :  { %v1094_v61 = vmul.f32 %v1090_v56, %v1721_v10 }
 0xe2e   :  { %v1096_v57 = vadd.f32 1e-12, %v1094_v61 }
 0xe30   :  { %1528 = vrsqrt.f32 %v1096_v57  ;;  %vm1104_vm9 = vweird.f32 %v1096_v57 }
 0xe36   :  { %v1529_v58 = vpop.eup %1528 }
 0xe37   :  { %v1099_v60 = vmul.f32 %v1529_v58, %v1096_v57  ;;  %vm1105_vm8 = vweird.f32 %v1529_v58 }
 0xe38   :  { %vm1106_vm10 = vmor %vm1104_vm9, %vm1105_vm8 }
 0xe39   :  { %v1100_v62 = vmul.f32 %v1529_v58, %v1099_v60 }
 0xe3b   :  { %v1101_v52 = vmul.f32 0.5, %v1100_v62 }
 0xe3d   :  { %v1102_v63 = vsub.f32 1.5, %v1101_v52 }
 0xe3f   :  { %v1103_v0 = vmul.f32 %v1529_v58, %v1102_v63 }
 0xe41   :  { %v1107_v3 = vsel %vm1106_vm10, %v1529_v58, %v1103_v0 }
 0xe42   :  { %v1118_v4 = vmul.f32 %v1107_v3, %v1084_v44 }
 0xe44   :  { %v1123_v25 = vmul.f32 %v1470_v1, %v1118_v4 }
 0xe46   :  { %v2044_v6 = vadd.f32 %v1471_v5, %v1123_v25 }
 0xe48   :  { %1430 = vmatmul.msk.f32.vlgmr.msrb.gmra.mxu2 %vm86_vm0, %v2044_v6 }
 0xe89   :  { %v1093_v7 = vpop.xlane.xlu2 %1092 }
 0xe8a   :  { %v1095_v8 = vmul.f32 %v1093_v7, %v1721_v10 }
 0xe8c   :  { %v1097_v9 = vadd.f32 1e-12, %v1095_v8 }
 0xe8e   :  { %1530 = vrsqrt.f32 %v1097_v9  ;;  %vm1114_vm12 = vweird.f32 %v1097_v9 }
 0xe94   :  { %v1531_v2 = vpop.eup %1530 }
 0xe95   :  { %v1109_v11 = vmul.f32 %v1531_v2, %v1097_v9  ;;  %vm1115_vm11 = vweird.f32 %v1531_v2 }
 0xe96   :  { %vm1116_vm14 = vmor %vm1114_vm12, %vm1115_vm11 }
 0xe97   :  { %v1110_v12 = vmul.f32 %v1531_v2, %v1109_v11  ;;  %v1297_v11 = vld [vmem:[%s2136_s16 + $0x10] sm:$0xff] }
 0xe99   :  { %v1111_v13 = vmul.f32 0.5, %v1110_v12  ;;  %v1296_v12 = vld [vmem:[%s2136_s16 + $0x8] sm:$0xff] }
 0xe9b   :  { %v1112_v14 = vsub.f32 1.5, %v1111_v13 }
 0xe9d   :  { %v1113_v15 = vmul.f32 %v1531_v2, %v1112_v14  ;;  %v1295_v14 = vld [vmem:[%s2136_s16] sm:$0xff] }
 0xe9f   :  { %v1117_v50 = vsel %vm1116_vm14, %v1531_v2, %v1113_v15  ;;  %v1298_v2 = vld [vmem:[%s2136_s16 + $0x18] sm:$0xff] }
 0xea0   :  { %v1119_v16 = vmul.f32 %v1117_v50, %v1085_v48  ;;  %1318 = vmatpush.msra.mxu3 %v1298_v2 }
 0xea2   :  { %v1124_v17 = vmul.f32 %v1470_v1, %v1119_v16  ;;  %1319 = vmatpush.msra.mxu3 %v1297_v11 }
 0xea4   :  { %v1129_v18 = vadd.f32 %v1471_v5, %v1124_v17  ;;  %1320 = vmatpush.msra.mxu3 %v1296_v12 }
 0xea6   :  { %1431 = vmatmul.msk.f32.gmra.mxu2 %vm86_vm0, %v1129_v18  ;;  %1321 = vmatpush.msra.mxu3 %v1295_v14 }
 0xecb   :  { %v1163_v30 = vpop.f32.mrf.mxu2 }
 0xecc   :  { %v1164_v32 = vadd.f32 %v1472_v29, %v1163_v30 }
 0xece   :  { %v1171_v31 = vmul.f32 0.044715, %v1164_v32  ;;  %v1169_v38 = vmul.f32 0.5, %v1164_v32 }
 0xed0   :  { %v1173_v33 = vmul.f32 %v1171_v31, %v1164_v32 }
 0xed2   :  { %v1175_v34 = vmul.f32 %v1173_v33, %v1164_v32 }
 0xed4   :  { %v1177_v35 = vadd.f32 %v1175_v34, %v1164_v32 }
 0xed6   :  { %v1179_v36 = vmul.f32 0.7978846, %v1177_v35 }
 0xed8   :  { %1532 = vtanh.f32 %v1179_v36  ;;  %v1475_v36 = vld [vmem:[%s2135_s15 + $0x1] ss:$0 sm:$0xff] }
 0xede   :  { %v1533_v37 = vpop.eup %1532 }
 0xedf   :  { %v1183_v39 = vadd.f32 1.0, %v1533_v37 }
 0xee1   :  { %v1185_v40 = vmul.f32 %v1183_v39, %v1169_v38 }
 0xee3   :  { %1441 = vmatmul.msk.f32.vlgmr.msrb.gmra.mxu1 %vm628_vm13, %v1185_v40 }
 0xf29   :  { %v1166_v41 = vpop.f32.mrf.mxu2 }
 0xf2a   :  { %v1167_v42 = vadd.f32 %v1472_v29, %v1166_v41  ;;  %v1330_v41 = vld [vmem:[#allocation2 + $0x18] sm:$0xff] }
 0xf2b   :  { %1350 = vmatpush.msrb.mxu3 %v1330_v41 }
 0xf2c   :  { %v1172_v43 = vmul.f32 0.044715, %v1167_v42  ;;  %v1170_v48 = vmul.f32 0.5, %v1167_v42 }
 0xf2e   :  { %v1174_v44 = vmul.f32 %v1172_v43, %v1167_v42  ;;  %v1328_v43 = vld [vmem:[#allocation2 + $0x8] sm:$0xff] }
 0xf30   :  { %v1176_v45 = vmul.f32 %v1174_v44, %v1167_v42  ;;  %v1327_v44 = vld [vmem:[#allocation2] sm:$0xff] }
 0xf32   :  { %v1178_v46 = vadd.f32 %v1176_v45, %v1167_v42  ;;  %v1329_v42 = vld [vmem:[#allocation2 + $0x10] sm:$0xff]  ;;  %v1476_v45 = vld [vmem:[%s2137_s17] ss:$0 sm:$0xff] }
 0xf33   :  { %1351 = vmatpush.msrb.mxu3 %v1329_v42 }
 0xf34   :  { %v1180_v47 = vmul.f32 0.7978846, %v1178_v46 }
 0xf35   :  { %1352 = vmatpush.msrb.mxu3 %v1328_v43 }
 0xf36   :  { %1534 = vtanh.f32 %v1180_v47 }
 0xf37   :  { %1353 = vmatpush.msrb.mxu3 %v1327_v44 }
 0xf3c   :  { %v1535_v59 = vpop.eup %1534 }
 0xf3d   :  { %v1184_v49 = vadd.f32 1.0, %v1535_v59 }
 0xf3f   :  { %v1186_v51 = vmul.f32 %v1184_v49, %v1170_v48  ;;  %v1477_v48 = vld [vmem:[%s2139_s19] ss:$0 sm:$0xff] }
 0xf41   :  { %1442 = vmatmul.msk.f32.gmra.mxu1 %vm628_vm13, %v1186_v51 }
 0xf60   :  { %v1224_v53 = vpop.f32.mrf.mxu1 }
 0xf61   :  { %v1225_v54 = vadd.f32 %v1473_v27, %v1224_v53 }
 0xf63   :  { %v1230_v55 = vadd.f32 %v1225_v54, %v2044_v6 }
 0xf65   :  { %v1236_v56 = vsel %vm86_vm0, %v1230_v55, 0.0 }
 0xf66   :  { %1237 = vadd.xlane.f32.xlu1 %v1236_v56 }
 0xfbe   :  { %v1227_v61 = vpop.f32.mrf.mxu1 }
 0xfbf   :  { %v1228_v57 = vadd.f32 %v1473_v27, %v1227_v61 }
 0xfc1   :  { %v1231_v58 = vadd.f32 %v1228_v57, %v1129_v18 }
 0xfc3   :  { %v1239_v60 = vsel %vm86_vm0, %v1231_v58, 0.0 }
 0xfc4   :  { %1240 = vadd.xlane.f32.xlu0 %v1239_v60 }
 0xfd9   :  { %v1238_v62 = vpop.xlane.xlu1 %1237 }
 0xfda   :  { %v1242_v52 = vmul.f32 %v1238_v62, %v1721_v10 }
 0xfdc   :  { %v1244_v63 = vsub.f32 %v1230_v55, %v1242_v52 }
 0xfde   :  { %v1246_v0 = vmul.f32 %v1244_v63, %v1244_v63 }
 0xfe0   :  { %v1248_v1 = vsel %vm86_vm0, %v1246_v0, 0.0 }
 0xfe1   :  { %1249 = vadd.xlane.f32.xlu0 %v1248_v1 }
0x1037   :  { %v1241_v3 = vpop.xlane.xlu0 %1240 }
0x1038   :  { %v1243_v4 = vmul.f32 %v1241_v3, %v1721_v10 }
0x103a   :  { %v1245_v5 = vsub.f32 %v1231_v58, %v1243_v4 }
0x103c   :  { %v1247_v25 = vmul.f32 %v1245_v5, %v1245_v5 }
0x103e   :  { %v1251_v6 = vsel %vm86_vm0, %v1247_v25, 0.0 }
0x103f   :  { %1252 = vadd.xlane.f32.xlu2 %v1251_v6 }
0x1054   :  { %v1250_v7 = vpop.xlane.xlu0 %1249 }
0x1055   :  { %v1254_v8 = vmul.f32 %v1250_v7, %v1721_v10 }
0x1057   :  { %v1256_v9 = vadd.f32 1e-12, %v1254_v8 }
0x1059   :  { %1536 = vrsqrt.f32 %v1256_v9  ;;  %vm1264_vm15 = vweird.f32 %v1256_v9 }
0x105f   :  { %v1537_v13 = vpop.eup %1536 }
0x1060   :  { %v1259_v15 = vmul.f32 %v1537_v13, %v1256_v9  ;;  %vm1265_vm13 = vweird.f32 %v1537_v13 }
0x1061   :  { %vm1266_vm1 = vmor %vm1264_vm15, %vm1265_vm13 }
0x1062   :  { %v1260_v17 = vmul.f32 %v1537_v13, %v1259_v15 }
0x1064   :  { %v1261_v19 = vmul.f32 0.5, %v1260_v17 }
0x1066   :  { %v1262_v20 = vsub.f32 1.5, %v1261_v19 }
0x1068   :  { %v1263_v23 = vmul.f32 %v1537_v13, %v1262_v20 }
0x106a   :  { %v1267_v28 = vsel %vm1266_vm1, %v1537_v13, %v1263_v23 }
0x106b   :  { %v1278_v32 = vmul.f32 %v1267_v28, %v1244_v63 }
0x10b2   :  { %v1253_v50 = vpop.xlane.xlu2 %1252 }
0x10b3   :  { %v1255_v16 = vmul.f32 %v1253_v50, %v1721_v10  ;;  %v1474_v10 = vld [vmem:[%s2134_s14 + $0x1] ss:$0 sm:$0xff] }
0x10b4   :  { %v1283_v34 = vmul.f32 %v1474_v10, %v1278_v32 }
0x10b5   :  { %v1257_v18 = vadd.f32 1e-12, %v1255_v16 }
0x10b6   :  { %v1288_v38 = vadd.f32 %v1475_v36, %v1283_v34 }
0x10b7   :  { %1538 = vrsqrt.f32 %v1257_v18  ;;  %vm1274_vm3 = vweird.f32 %v1257_v18 }
0x10bd   :  { %v1539_v21 = vpop.eup %1538 }
0x10be   :  { %v1269_v22 = vmul.f32 %v1539_v21, %v1257_v18  ;;  %vm1275_vm2 = vweird.f32 %v1539_v21 }
0x10bf   :  { %vm1276_vm4 = vmor %vm1274_vm3, %vm1275_vm2 }
0x10c0   :  { %v1270_v24 = vmul.f32 %v1539_v21, %v1269_v22 }
0x10c2   :  { %v1271_v26 = vmul.f32 0.5, %v1270_v24 }
0x10c4   :  { %v1272_v29 = vsub.f32 1.5, %v1271_v26 }
0x10c6   :  { %v1273_v30 = vmul.f32 %v1539_v21, %v1272_v29 }
0x10c8   :  { %v1277_v31 = vsel %vm1276_vm4, %v1539_v21, %v1273_v30 }
0x10c9   :  { %v1279_v33 = vmul.f32 %v1277_v31, %v1245_v5 }
0x10cb   :  { %v1284_v35 = vmul.f32 %v1474_v10, %v1279_v33 }
0x10cd   :  { %v1289_v37 = vadd.f32 %v1475_v36, %v1284_v35 }
0x10cf   :  { %v1291_v39 = vrot.slane %v1289_v37, 7 }
0x10d1   :  { %v1294_v40 = vsel %vm1293_vm5, %v1288_v38, %v1291_v39 }
0x10d2   :  { %1445 = vmatmul.msk.f32.vlgmr.msra.gmra.mxu3 %vm86_vm0, %v1294_v40 }
0x1155   :  { %v1323_v46 = vpop.f32.mrf.mxu3 }
0x1156   :  { %v1324_v47 = vadd.f32 %v1476_v45, %v1323_v46 }
0x1158   :  { %1540 = vtanh.f32 %v1324_v47 }
0x115e   :  { %v1541_v59 = vpop.eup %1540 }
0x115f   :  { %1446 = vmatmul.msk.f32.vlgmr.msrb.gmra.mxu3 %vm86_vm0, %v1541_v59 }
0x11e2   :  { %v1355_v49 = vpop.f32.mrf.mxu3 }
0x11e3   :  { %v1356_v51 = vadd.f32 %v1477_v48, %v1355_v49 }
0x11e5   :  { %1359 = vst.msk [vmem:[#allocation5] sm:$0x3] %vm1358_vm6, %v1356_v51 }
0x11e6   :  { %1370 = dma.vmem_to_hbm [thread:$0]  %s1366_s27, 32, %s1368_s0, [#allocation4]  }
0x11e7   :  { %1592 = dma.done.wait [#allocation4], 32  }
0x11e8   :  { %1593 = vsyncadd [#allocation4], 4294967264 }
0x11e9   :  { %1375 = vsyncpa [#allocation3], 1 }
0x11ea   :  { %1376 = vsyncpa [#allocation4], 1 }

</bundles_post_ra>
